<compile_context>
chip_gen: v7x
topology: tpu7x:2x2x1
jax: 0.10.0
libtpu: 0.0.40
codegen_flags: <defaults>
</compile_context>

<pallas_src>
import math
import functools

import numpy as np
import jax
import jax.numpy as jnp
from jax.experimental import pallas as pl
from jax.experimental.pallas import tpu as pltpu


# Matmul operand dtype for the MXU (accumulation is always f32).  Set to
# jnp.float32 for a bit-exact f32 reference; bf16 doubles MXU throughput and
# halves the VMEM/HBM matmul-operand footprint on v5e/v6e/v7x.
MXU_DTYPE = jnp.bfloat16

_VMEM_LIMIT = 32 * 1024 * 1024   # <= scoped default on v6e/v7x, safe on v5e


def _round_up(n, m):
    return ((n + m - 1) // m) * m


def _pad_rows(x, mp):
    m = x.shape[0]
    return x if mp == m else jnp.pad(x, ((0, mp - m), (0, 0)))


def _pad_cols(x, np_):
    n = x.shape[1]
    return x if np_ == n else jnp.pad(x, ((0, 0), (0, np_ - n)))


# ----------------------------------------------------------------------------
# Pallas kernels
# ----------------------------------------------------------------------------

def _matmul_bias_kernel(x_ref, w_ref, b_ref, o_ref, *, activation):
    x = x_ref[...].astype(MXU_DTYPE)
    w = w_ref[...].astype(MXU_DTYPE)
    y = jnp.dot(x, w, preferred_element_type=jnp.float32) + b_ref[...]
    if activation == "relu":
        y = jnp.maximum(y, 0.0)
    o_ref[...] = y.astype(o_ref.dtype)


def _ln_matmul_bias_kernel(x_ref, g_ref, be_ref, w_ref, b_ref, o_ref, *,
                           activation, eps):
    # pre-LayerNorm fused into the matmul: LN is pure VPU/EUP work that hides
    # under the MXU-bound dot; the normalized x never touches HBM.
    x = x_ref[...].astype(jnp.float32)
    mu = jnp.mean(x, axis=-1, keepdims=True)
    var = jnp.mean(jnp.square(x - mu), axis=-1, keepdims=True)
    xn = (x - mu) * jax.lax.rsqrt(var + eps) * g_ref[...] + be_ref[...]
    w = w_ref[...].astype(MXU_DTYPE)
    y = jnp.dot(xn.astype(MXU_DTYPE), w, preferred_element_type=jnp.float32)
    y = y + b_ref[...]
    if activation == "relu":
        y = jnp.maximum(y, 0.0)
    o_ref[...] = y.astype(o_ref.dtype)


def _ln_ffn_kernel(x_ref, g_ref, be_ref, w1_ref, b1_ref, w2_ref, b2_ref, o_ref,
                   *, eps):
    # Fused LN -> (x @ w1 + b1) -> ReLU -> (@ w2 + b2); hidden stays in VMEM.
    x = x_ref[...].astype(jnp.float32)
    mu = jnp.mean(x, axis=-1, keepdims=True)
    var = jnp.mean(jnp.square(x - mu), axis=-1, keepdims=True)
    xn = (x - mu) * jax.lax.rsqrt(var + eps) * g_ref[...] + be_ref[...]
    h = jnp.dot(xn.astype(MXU_DTYPE), w1_ref[...].astype(MXU_DTYPE),
                preferred_element_type=jnp.float32) + b1_ref[...]
    h = jnp.maximum(h, 0.0)
    y = jnp.dot(h.astype(MXU_DTYPE), w2_ref[...].astype(MXU_DTYPE),
                preferred_element_type=jnp.float32) + b2_ref[...]
    o_ref[...] = y.astype(o_ref.dtype)


def _layernorm_kernel(x_ref, g_ref, b_ref, o_ref, *, eps):
    x = x_ref[...].astype(jnp.float32)
    mu = jnp.mean(x, axis=-1, keepdims=True)
    var = jnp.mean(jnp.square(x - mu), axis=-1, keepdims=True)
    y = (x - mu) * jax.lax.rsqrt(var + eps)
    o_ref[...] = (y * g_ref[...] + b_ref[...]).astype(o_ref.dtype)


def _attn_kernel(qkv_ref, m_ref, o_ref, *, heads, d_model, scale):
    # One batch element per grid step, all heads handled inside so the output
    # store is lane-dense (T, D) and the mask is loaded once per batch.
    qkv = qkv_ref[0].astype(jnp.float32)        # (T, 3D)
    m = m_ref[0].astype(jnp.float32)            # (1, T), 1.0 = valid key position
    D = d_model
    dk = D // heads
    q = qkv[:, 0:D]
    k = qkv[:, D:2 * D]
    v = qkv[:, 2 * D:3 * D]
    neg = jnp.finfo(jnp.float32).min
    outs = []
    for h in range(heads):                       # static, small head count
        qh = q[:, h * dk:(h + 1) * dk].astype(MXU_DTYPE)
        kh = k[:, h * dk:(h + 1) * dk].astype(MXU_DTYPE)
        vh = v[:, h * dk:(h + 1) * dk].astype(MXU_DTYPE)
        # scores[i, j] = q[i] . k[j] / sqrt(dk)
        s = jax.lax.dot_general(qh, kh, (((1,), (1,)), ((), ())),
                                preferred_element_type=jnp.float32) * scale
        s = jnp.where(m > 0.0, s, neg)           # masked_fill(mask==0, min)
        s = s - jnp.max(s, axis=-1, keepdims=True)
        e = jnp.exp(s)
        inv = pl.reciprocal(jnp.sum(e, axis=-1, keepdims=True), approx=True)
        attn = jnp.where(m > 0.0, e * inv, 0.0)  # masked_fill(mask==0, 0) post softmax
        outs.append(jnp.dot(attn.astype(MXU_DTYPE), vh,
                            preferred_element_type=jnp.float32))
    o_ref[0] = jnp.concatenate(outs, axis=-1).astype(o_ref.dtype)


# ----------------------------------------------------------------------------
# Pallas wrappers (tiling / padding / BlockSpecs)
# ----------------------------------------------------------------------------

def pallas_linear(x, w, b, *, activation=None, ln=None, ln_eps=1e-12,
                  tm=256, tn=256):
    """y = act((LN(x) if ln else x) @ w + b); x:(M,K), w:(K,N), b:(N,)."""
    M, K = x.shape
    N = w.shape[1]
    tm = min(tm, _round_up(M, 8))
    tn = min(tn, _round_up(N, 128))
    Mp, Np = _round_up(M, tm), _round_up(N, tn)
    xp = _pad_rows(x, Mp)
    wp = _pad_cols(w, Np)
    bp = _pad_cols(b.reshape(1, N), Np)

    x_spec = pl.BlockSpec((tm, K), lambda i, j: (i, 0))
    w_spec = pl.BlockSpec((K, tn), lambda i, j: (0, j))
    b_spec = pl.BlockSpec((1, tn), lambda i, j: (0, j))
    o_spec = pl.BlockSpec((tm, tn), lambda i, j: (i, j))
    cparams = pltpu.CompilerParams(
        dimension_semantics=("parallel", "parallel"),
        vmem_limit_bytes=_VMEM_LIMIT)

    if ln is None:
        kern = functools.partial(_matmul_bias_kernel, activation=activation)
        out = pl.pallas_call(
            kern,
            out_shape=jax.ShapeDtypeStruct((Mp, Np), x.dtype),
            grid=(Mp // tm, Np // tn),
            in_specs=[x_spec, w_spec, b_spec],
            out_specs=o_spec,
            compiler_params=cparams,
        )(xp, wp, bp)
    else:
        gamma, beta = ln
        v_spec = pl.BlockSpec((1, K), lambda i, j: (0, 0))
        kern = functools.partial(_ln_matmul_bias_kernel,
                                 activation=activation, eps=ln_eps)
        out = pl.pallas_call(
            kern,
            out_shape=jax.ShapeDtypeStruct((Mp, Np), x.dtype),
            grid=(Mp // tm, Np // tn),
            in_specs=[x_spec, v_spec, v_spec, w_spec, b_spec],
            out_specs=o_spec,
            compiler_params=cparams,
        )(xp, gamma.reshape(1, K), beta.reshape(1, K), wp, bp)
    return out[:M, :N]


def pallas_ln_ffn(x, gamma, beta, w1, b1, w2, b2, *, eps=1e-12, tm=256):
    """Fused LN(x) @ w1 + b1 -> ReLU -> @ w2 + b2, tiled over rows."""
    M, D = x.shape
    H = w1.shape[1]
    tm = min(tm, _round_up(M, 8))
    Mp = _round_up(M, tm)
    xp = _pad_rows(x, Mp)
    out = pl.pallas_call(
        functools.partial(_ln_ffn_kernel, eps=eps),
        out_shape=jax.ShapeDtypeStruct((Mp, D), x.dtype),
        grid=(Mp // tm,),
        in_specs=[
            pl.BlockSpec((tm, D), lambda i: (i, 0)),
            pl.BlockSpec((1, D), lambda i: (0, 0)),
            pl.BlockSpec((1, D), lambda i: (0, 0)),
            pl.BlockSpec((D, H), lambda i: (0, 0)),
            pl.BlockSpec((1, H), lambda i: (0, 0)),
            pl.BlockSpec((H, D), lambda i: (0, 0)),
            pl.BlockSpec((1, D), lambda i: (0, 0)),
        ],
        out_specs=pl.BlockSpec((tm, D), lambda i: (i, 0)),
        compiler_params=pltpu.CompilerParams(
            dimension_semantics=("parallel",),
            vmem_limit_bytes=_VMEM_LIMIT),
    )(xp, gamma.reshape(1, D), beta.reshape(1, D),
      w1, b1.reshape(1, H), w2, b2.reshape(1, D))
    return out[:M]


def pallas_layernorm(x, gamma, beta, *, eps=1e-12, tm=512):
    """Row-tiled LayerNorm over the last dim (espnet LayerNorm eps=1e-12)."""
    M, D = x.shape
    tm = min(tm, _round_up(M, 8))
    Mp = _round_up(M, tm)
    xp = _pad_rows(x, Mp)
    out = pl.pallas_call(
        functools.partial(_layernorm_kernel, eps=eps),
        out_shape=jax.ShapeDtypeStruct((Mp, D), x.dtype),
        grid=(Mp // tm,),
        in_specs=[
            pl.BlockSpec((tm, D), lambda i: (i, 0)),
            pl.BlockSpec((1, D), lambda i: (0, 0)),
            pl.BlockSpec((1, D), lambda i: (0, 0)),
        ],
        out_specs=pl.BlockSpec((tm, D), lambda i: (i, 0)),
        compiler_params=pltpu.CompilerParams(
            dimension_semantics=("parallel",),
            vmem_limit_bytes=_VMEM_LIMIT),
    )(xp, gamma.reshape(1, D), beta.reshape(1, D))
    return out[:M]


def pallas_attention(qkv, mask, heads):
    """qkv: (B, T, 3D) fused Q|K|V; mask: (B, 1, T) float (1 = valid key)."""
    B, T, threeD = qkv.shape
    D = threeD // 3
    scale = 1.0 / math.sqrt(D // heads)
    # TODO(synk): add flash-style online-softmax KV tiling for long T instead of
    #             materializing the full (T, T) score matrix per head.
    return pl.pallas_call(
        functools.partial(_attn_kernel, heads=heads, d_model=D, scale=scale),
        out_shape=jax.ShapeDtypeStruct((B, T, D), qkv.dtype),
        grid=(B,),
        in_specs=[
            pl.BlockSpec((1, T, threeD), lambda b: (b, 0, 0)),
            pl.BlockSpec((1, 1, T), lambda b: (b, 0, 0)),
        ],
        out_specs=pl.BlockSpec((1, T, D), lambda b: (b, 0, 0)),
        compiler_params=pltpu.CompilerParams(
            dimension_semantics=("parallel",),
            vmem_limit_bytes=_VMEM_LIMIT),
    )(qkv, mask)


# ----------------------------------------------------------------------------
# Glue (im2col, positional encoding, parameter setup)
# ----------------------------------------------------------------------------

def im2col(x, k, s):
    """x: (B, T, F, C) channels-last -> (B, To, Fo, k*k*C), valid conv, stride s."""
    B, T, F, C = x.shape
    To = (T - k) // s + 1
    Fo = (F - k) // s + 1
    cols = []
    for i in range(k):
        for j in range(k):
            cols.append(x[:, i:i + s * (To - 1) + 1:s, j:j + s * (Fo - 1) + 1:s, :])
    return jnp.concatenate(cols, axis=-1)


def positional_encoding(T, d):
    """Sinusoidal PE computed with numpy -> folds into a trace-time constant."""
    pos = np.arange(T, dtype=np.float32)[:, None]
    div = np.exp(np.arange(0, d, 2, dtype=np.float32) * (-math.log(10000.0) / d))
    pe = np.zeros((T, d), np.float32)
    pe[:, 0::2] = np.sin(pos * div)
    pe[:, 1::2] = np.cos(pos * div)
    return jnp.asarray(pe)


def init_params(key, idim, odim, heads, linear_units, num_blocks):
    f1 = (idim - 1) // 2
    f2 = (f1 - 1) // 2
    n_keys = 6 + 6 * num_blocks
    keys = list(jax.random.split(key, n_keys))
    it = iter(keys)

    def dense(shape):
        return jax.random.normal(next(it), shape, jnp.float32) * 0.02

    params = {
        # Conv2dSubsampling: Conv2d(1, odim, 3, 2) -> ReLU -> Conv2d(odim, odim, 3, 2) -> ReLU
        "conv1_w": dense((9, odim)),            "conv1_b": jnp.zeros((odim,), jnp.float32),
        "conv2_w": dense((9 * odim, odim)),     "conv2_b": jnp.zeros((odim,), jnp.float32),
        # out Linear(odim * f2, odim)
        "embed_w": dense((odim * f2, odim)),    "embed_b": jnp.zeros((odim,), jnp.float32),
        # after_norm
        "after_g": jnp.ones((odim,), jnp.float32),
        "after_b": jnp.zeros((odim,), jnp.float32),
        "blocks": [],
    }
    for _ in range(num_blocks):
        wq, wk, wv = dense((odim, odim)), dense((odim, odim)), dense((odim, odim))
        blk = {
            # Q/K/V projections fused into one (D, 3D) matmul
            "w_qkv": jnp.concatenate([wq, wk, wv], axis=1),
            "b_qkv": jnp.zeros((3 * odim,), jnp.float32),
            "wo": dense((odim, odim)), "bo": jnp.zeros((odim,), jnp.float32),
            "ff_w1": dense((odim, linear_units)), "ff_b1": jnp.zeros((linear_units,), jnp.float32),
            "ff_w2": dense((linear_units, odim)), "ff_b2": jnp.zeros((odim,), jnp.float32),
            "g1": jnp.ones((odim,), jnp.float32), "be1": jnp.zeros((odim,), jnp.float32),
            "g2": jnp.ones((odim,), jnp.float32), "be2": jnp.zeros((odim,), jnp.float32),
        }
        params["blocks"].append(blk)
    return params


# ----------------------------------------------------------------------------
# Model forward (mirrors TransformerEncoder.forward, eval mode)
# ----------------------------------------------------------------------------

def mha_block(x, mask_f, p, heads):
    B, T, D = x.shape
    # pre-LayerNorm (norm1) fused into the single Q|K|V projection matmul.
    qkv = pallas_linear(x.reshape(-1, D), p["w_qkv"], p["b_qkv"],
                        ln=(p["g1"], p["be1"]))                      # (B*T, 3D)
    o = pallas_attention(qkv.reshape(B, T, 3 * D), mask_f, heads)    # (B, T, D)
    return pallas_linear(o.reshape(-1, D), p["wo"], p["bo"]).reshape(B, T, D)


def encoder_layer(x, mask_f, p, heads):
    B, T, D = x.shape
    x = x + mha_block(x, mask_f, p, heads)       # attention dropout == identity (eval)
    # pre-LayerNorm (norm2) + PositionwiseFeedForward fused into one kernel.
    h = pallas_ln_ffn(x.reshape(-1, D), p["g2"], p["be2"],
                      p["ff_w1"], p["ff_b1"], p["ff_w2"], p["ff_b2"])
    return x + h.reshape(B, T, D)                # dropout == identity (eval)


def transformer_encoder_forward(params, xs_pad, ilens, *, heads):
    B, L, F = xs_pad.shape
    odim = params["after_g"].shape[0]

    # masks = ~make_pad_mask(ilens)[:, None, :]   (True = valid)
    seq = jnp.arange(L)
    masks = (seq[None, :] < ilens[:, None])[:, None, :]              # (B, 1, L) bool

    # ---- Conv2dSubsampling (im2col + tiled Pallas matmul, channels-last) ----
    x = xs_pad[:, :, :, None]                                        # (B, L, F, 1)
    p1 = im2col(x, 3, 2)                                             # (B, T1, F1, 9)
    _, T1, F1, P1 = p1.shape
    h1 = pallas_linear(p1.reshape(-1, P1), params["conv1_w"], params["conv1_b"],
                       activation="relu").reshape(B, T1, F1, odim)
    p2 = im2col(h1, 3, 2)                                            # (B, T2, F2, 9*odim)
    _, T2, F2, P2 = p2.shape
    h2 = pallas_linear(p2.reshape(-1, P2), params["conv2_w"], params["conv2_b"],
                       activation="relu").reshape(B, T2, F2, odim)
    # PyTorch: (B, C, T, F).transpose(1, 2).view(B, T, C*F)  -> flatten (C, F) in that order
    h2 = jnp.transpose(h2, (0, 1, 3, 2)).reshape(B, T2, odim * F2)
    x = pallas_linear(h2.reshape(-1, odim * F2), params["embed_w"],
                      params["embed_b"]).reshape(B, T2, odim)
    # PositionalEncoding: x * sqrt(d_model) + pe ; positional dropout == identity (eval)
    x = x * math.sqrt(odim) + positional_encoding(T2, odim)[None, :, :]
    sub_masks = masks[:, :, :-2:2][:, :, :-2:2]                      # (B, 1, T2) bool
    mask_f = sub_masks.astype(jnp.float32)                           # read once per batch

    # ---- Encoder blocks ----
    for blk in params["blocks"]:
        x = encoder_layer(x, mask_f, blk, heads)

    # ---- after_norm + olens ----
    x = pallas_layernorm(x.reshape(-1, odim), params["after_g"],
                         params["after_b"]).reshape(B, T2, odim)
    olens = jnp.sum(sub_masks[:, 0, :].astype(jnp.int32), axis=-1)
    return x, olens


# ----------------------------------------------------------------------------

if __name__ == "__main__":
    B, L, idim = 2, 16, 16
    odim, heads, linear_units, num_blocks = 32, 4, 64, 2

    key = jax.random.PRNGKey(0)
    kx, kp = jax.random.split(key)
    xs_pad = jax.random.normal(kx, (B, L, idim), jnp.float32)
    ilens = jnp.array([16, 6], jnp.int32)   # second sequence has padding

    params = init_params(kp, idim, odim, heads, linear_units, num_blocks)

    fwd = jax.jit(functools.partial(transformer_encoder_forward, heads=heads))
    out, olens = fwd(params, xs_pad, ilens)
    jax.block_until_ready(out)
    jax.block_until_ready(olens)

    Tsub = ((L - 1) // 2 - 1) // 2           # same subsampling factor applies to time
    assert out.shape == (B, Tsub, odim), out.shape
    assert olens.shape == (B,), olens.shape
    assert bool(jnp.all(jnp.isfinite(out)))
    print("KERNEL_OK")
</pallas_src>

<mosaic_0001>
module attributes {stable_mosaic.version = 11 : i64} {
  func.func @_matmul_bias_kernel(%arg0: i32, %arg1: i32, %arg2: memref<104x9xf32, #tpu.memory_space<vmem>>, %arg3: memref<9x128xf32, #tpu.memory_space<vmem>>, %arg4: memref<1x128xf32, #tpu.memory_space<vmem>>, %arg5: memref<104x128xf32, #tpu.memory_space<vmem>>) attributes {dimension_semantics = [#tpu.dimension_semantics<parallel>, #tpu.dimension_semantics<parallel>], iteration_bounds = array<i64: 1, 1>, scalar_prefetch = 0 : i64, scratch_operands = 0 : i64, tpu.core_type = #tpu.core_type<tc>, window_params = [{transform_indices = @transform_0, window_bounds = array<i64: 104, 9>}, {transform_indices = @transform_1, window_bounds = array<i64: 9, 128>}, {transform_indices = @transform_2, window_bounds = array<i64: 1, 128>}, {transform_indices = @transform_3, window_bounds = array<i64: 104, 128>}]} {
    %c0 = arith.constant 0 : index
    %c0_0 = arith.constant 0 : index
    %0 = vector.load %arg2[%c0, %c0_0] : memref<104x9xf32, #tpu.memory_space<vmem>>, vector<104x9xf32>
    %1 = arith.truncf %0 : vector<104x9xf32> to vector<104x9xbf16>
    %c0_1 = arith.constant 0 : index
    %c0_2 = arith.constant 0 : index
    %2 = vector.load %arg3[%c0_1, %c0_2] : memref<9x128xf32, #tpu.memory_space<vmem>>, vector<9x128xf32>
    %3 = arith.truncf %2 : vector<9x128xf32> to vector<9x128xbf16>
    %cst = arith.constant dense<0.000000e+00> : vector<104x128xf32>
    %4 = tpu.matmul %1, %3, %cst {dimension_numbers = #tpu.dot_dimension_numbers<[1], [0], [0], [1], [0, 0, 1, 1], [], []>} : vector<104x9xbf16>, vector<9x128xbf16>, vector<104x128xf32> -> vector<104x128xf32>
    %c0_3 = arith.constant 0 : index
    %c0_4 = arith.constant 0 : index
    %5 = vector.load %arg4[%c0_3, %c0_4] : memref<1x128xf32, #tpu.memory_space<vmem>>, vector<1x128xf32>
    %6 = vector.broadcast %5 : vector<1x128xf32> to vector<104x128xf32>
    %7 = arith.addf %4, %6 : vector<104x128xf32>
    %cst_5 = arith.constant 0.000000e+00 : f32
    %8 = vector.broadcast %cst_5 : f32 to vector<104x128xf32>
    %9 = arith.maximumf %7, %8 : vector<104x128xf32>
    %c0_6 = arith.constant 0 : index
    %c0_7 = arith.constant 0 : index
    %10 = vector.load %arg5[%c0_6, %c0_7] : memref<104x128xf32, #tpu.memory_space<vmem>>, vector<104x128xf32>
    tpu.vector_store %arg5[%c0_6, %c0_7], %9 {strides = array<i32>} : memref<104x128xf32, #tpu.memory_space<vmem>>, vector<104x128xf32>,
    return
  }
  func.func @transform_0(%arg0: i32, %arg1: i32) -> (i32, i32) {
    %c0_i32 = arith.constant 0 : i32
    %c0_i32_0 = arith.constant 0 : i32
    return %arg0, %c0_i32 : i32, i32
  }
  func.func @transform_1(%arg0: i32, %arg1: i32) -> (i32, i32) {
    %c0_i32 = arith.constant 0 : i32
    %c0_i32_0 = arith.constant 0 : i32
    return %c0_i32, %arg1 : i32, i32
  }
  func.func @transform_2(%arg0: i32, %arg1: i32) -> (i32, i32) {
    %c0_i32 = arith.constant 0 : i32
    %c0_i32_0 = arith.constant 0 : i32
    return %c0_i32, %arg1 : i32, i32
  }
  func.func @transform_3(%arg0: i32, %arg1: i32) -> (i32, i32) {
    %c0_i32 = arith.constant 0 : i32
    return %arg0, %arg1 : i32, i32
  }
}

module attributes {stable_mosaic.version = 11 : i64} {
  func.func @_matmul_bias_kernel(%arg0: i32, %arg1: i32, %arg2: memref<24x288xf32, #tpu.memory_space<vmem>>, %arg3: memref<288x128xf32, #tpu.memory_space<vmem>>, %arg4: memref<1x128xf32, #tpu.memory_space<vmem>>, %arg5: memref<24x128xf32, #tpu.memory_space<vmem>>) attributes {dimension_semantics = [#tpu.dimension_semantics<parallel>, #tpu.dimension_semantics<parallel>], iteration_bounds = array<i64: 1, 1>, scalar_prefetch = 0 : i64, scratch_operands = 0 : i64, tpu.core_type = #tpu.core_type<tc>, window_params = [{transform_indices = @transform_0, window_bounds = array<i64: 24, 288>}, {transform_indices = @transform_1, window_bounds = array<i64: 288, 128>}, {transform_indices = @transform_2, window_bounds = array<i64: 1, 128>}, {transform_indices = @transform_3, window_bounds = array<i64: 24, 128>}]} {
    %c0 = arith.constant 0 : index
    %c0_0 = arith.constant 0 : index
    %0 = vector.load %arg2[%c0, %c0_0] : memref<24x288xf32, #tpu.memory_space<vmem>>, vector<24x288xf32>
    %1 = arith.truncf %0 : vector<24x288xf32> to vector<24x288xbf16>
    %c0_1 = arith.constant 0 : index
    %c0_2 = arith.constant 0 : index
    %2 = vector.load %arg3[%c0_1, %c0_2] : memref<288x128xf32, #tpu.memory_space<vmem>>, vector<288x128xf32>
    %3 = arith.truncf %2 : vector<288x128xf32> to vector<288x128xbf16>
    %cst = arith.constant dense<0.000000e+00> : vector<24x128xf32>
    %4 = tpu.matmul %1, %3, %cst {dimension_numbers = #tpu.dot_dimension_numbers<[1], [0], [0], [1], [0, 0, 1, 1], [], []>} : vector<24x288xbf16>, vector<288x128xbf16>, vector<24x128xf32> -> vector<24x128xf32>
    %c0_3 = arith.constant 0 : index
    %c0_4 = arith.constant 0 : index
    %5 = vector.load %arg4[%c0_3, %c0_4] : memref<1x128xf32, #tpu.memory_space<vmem>>, vector<1x128xf32>
    %6 = vector.broadcast %5 : vector<1x128xf32> to vector<24x128xf32>
    %7 = arith.addf %4, %6 : vector<24x128xf32>
    %cst_5 = arith.constant 0.000000e+00 : f32
    %8 = vector.broadcast %cst_5 : f32 to vector<24x128xf32>
    %9 = arith.maximumf %7, %8 : vector<24x128xf32>
    %c0_6 = arith.constant 0 : index
    %c0_7 = arith.constant 0 : index
    %10 = vector.load %arg5[%c0_6, %c0_7] : memref<24x128xf32, #tpu.memory_space<vmem>>, vector<24x128xf32>
    tpu.vector_store %arg5[%c0_6, %c0_7], %9 {strides = array<i32>} : memref<24x128xf32, #tpu.memory_space<vmem>>, vector<24x128xf32>,
    return
  }
  func.func @transform_0(%arg0: i32, %arg1: i32) -> (i32, i32) {
    %c0_i32 = arith.constant 0 : i32
    %c0_i32_0 = arith.constant 0 : i32
    return %arg0, %c0_i32 : i32, i32
  }
  func.func @transform_1(%arg0: i32, %arg1: i32) -> (i32, i32) {
    %c0_i32 = arith.constant 0 : i32
    %c0_i32_0 = arith.constant 0 : i32
    return %c0_i32, %arg1 : i32, i32
  }
  func.func @transform_2(%arg0: i32, %arg1: i32) -> (i32, i32) {
    %c0_i32 = arith.constant 0 : i32
    %c0_i32_0 = arith.constant 0 : i32
    return %c0_i32, %arg1 : i32, i32
  }
  func.func @transform_3(%arg0: i32, %arg1: i32) -> (i32, i32) {
    %c0_i32 = arith.constant 0 : i32
    return %arg0, %arg1 : i32, i32
  }
}

module attributes {stable_mosaic.version = 11 : i64} {
  func.func @_matmul_bias_kernel(%arg0: i32, %arg1: i32, %arg2: memref<8x96xf32, #tpu.memory_space<vmem>>, %arg3: memref<96x128xf32, #tpu.memory_space<vmem>>, %arg4: memref<1x128xf32, #tpu.memory_space<vmem>>, %arg5: memref<8x128xf32, #tpu.memory_space<vmem>>) attributes {dimension_semantics = [#tpu.dimension_semantics<parallel>, #tpu.dimension_semantics<parallel>], iteration_bounds = array<i64: 1, 1>, scalar_prefetch = 0 : i64, scratch_operands = 0 : i64, tpu.core_type = #tpu.core_type<tc>, window_params = [{transform_indices = @transform_0, window_bounds = array<i64: 8, 96>}, {transform_indices = @transform_1, window_bounds = array<i64: 96, 128>}, {transform_indices = @transform_2, window_bounds = array<i64: 1, 128>}, {transform_indices = @transform_3, window_bounds = array<i64: 8, 128>}]} {
    %c0 = arith.constant 0 : index
    %c0_0 = arith.constant 0 : index
    %0 = vector.load %arg2[%c0, %c0_0] : memref<8x96xf32, #tpu.memory_space<vmem>>, vector<8x96xf32>
    %1 = arith.truncf %0 : vector<8x96xf32> to vector<8x96xbf16>
    %c0_1 = arith.constant 0 : index
    %c0_2 = arith.constant 0 : index
    %2 = vector.load %arg3[%c0_1, %c0_2] : memref<96x128xf32, #tpu.memory_space<vmem>>, vector<96x128xf32>
    %3 = arith.truncf %2 : vector<96x128xf32> to vector<96x128xbf16>
    %cst = arith.constant dense<0.000000e+00> : vector<8x128xf32>
    %4 = tpu.matmul %1, %3, %cst {dimension_numbers = #tpu.dot_dimension_numbers<[1], [0], [0], [1], [0, 0, 1, 1], [], []>} : vector<8x96xbf16>, vector<96x128xbf16>, vector<8x128xf32> -> vector<8x128xf32>
    %c0_3 = arith.constant 0 : index
    %c0_4 = arith.constant 0 : index
    %5 = vector.load %arg4[%c0_3, %c0_4] : memref<1x128xf32, #tpu.memory_space<vmem>>, vector<1x128xf32>
    %6 = vector.broadcast %5 : vector<1x128xf32> to vector<8x128xf32>
    %7 = arith.addf %4, %6 : vector<8x128xf32>
    %c0_5 = arith.constant 0 : index
    %c0_6 = arith.constant 0 : index
    %8 = vector.load %arg5[%c0_5, %c0_6] : memref<8x128xf32, #tpu.memory_space<vmem>>, vector<8x128xf32>
    tpu.vector_store %arg5[%c0_5, %c0_6], %7 {strides = array<i32>} : memref<8x128xf32, #tpu.memory_space<vmem>>, vector<8x128xf32>,
    return
  }
  func.func @transform_0(%arg0: i32, %arg1: i32) -> (i32, i32) {
    %c0_i32 = arith.constant 0 : i32
    %c0_i32_0 = arith.constant 0 : i32
    return %arg0, %c0_i32 : i32, i32
  }
  func.func @transform_1(%arg0: i32, %arg1: i32) -> (i32, i32) {
    %c0_i32 = arith.constant 0 : i32
    %c0_i32_0 = arith.constant 0 : i32
    return %c0_i32, %arg1 : i32, i32
  }
  func.func @transform_2(%arg0: i32, %arg1: i32) -> (i32, i32) {
    %c0_i32 = arith.constant 0 : i32
    %c0_i32_0 = arith.constant 0 : i32
    return %c0_i32, %arg1 : i32, i32
  }
  func.func @transform_3(%arg0: i32, %arg1: i32) -> (i32, i32) {
    %c0_i32 = arith.constant 0 : i32
    return %arg0, %arg1 : i32, i32
  }
}

module attributes {stable_mosaic.version = 11 : i64} {
  func.func @_ln_matmul_bias_kernel(%arg0: i32, %arg1: i32, %arg2: memref<8x32xf32, #tpu.memory_space<vmem>>, %arg3: memref<1x32xf32, #tpu.memory_space<vmem>>, %arg4: memref<1x32xf32, #tpu.memory_space<vmem>>, %arg5: memref<32x128xf32, #tpu.memory_space<vmem>>, %arg6: memref<1x128xf32, #tpu.memory_space<vmem>>, %arg7: memref<8x128xf32, #tpu.memory_space<vmem>>) attributes {dimension_semantics = [#tpu.dimension_semantics<parallel>, #tpu.dimension_semantics<parallel>], iteration_bounds = array<i64: 1, 1>, scalar_prefetch = 0 : i64, scratch_operands = 0 : i64, tpu.core_type = #tpu.core_type<tc>, window_params = [{transform_indices = @transform_0, window_bounds = array<i64: 8, 32>}, {pipeline_mode = #tpu.pipeline_mode<synchronous>, transform_indices = @transform_1, window_bounds = array<i64: 1, 32>}, {pipeline_mode = #tpu.pipeline_mode<synchronous>, transform_indices = @transform_2, window_bounds = array<i64: 1, 32>}, {transform_indices = @transform_3, window_bounds = array<i64: 32, 128>}, {transform_indices = @transform_4, window_bounds = array<i64: 1, 128>}, {transform_indices = @transform_5, window_bounds = array<i64: 8, 128>}]} {
    %c0 = arith.constant 0 : index
    %c0_0 = arith.constant 0 : index
    %0 = vector.load %arg2[%c0, %c0_0] : memref<8x32xf32, #tpu.memory_space<vmem>>, vector<8x32xf32>
    %cst = arith.constant dense<0.000000e+00> : vector<8xf32>
    %1 = vector.multi_reduction <add>, %0, %cst [1] : vector<8x32xf32> to vector<8xf32>
    %2 = vector.shape_cast %1 : vector<8xf32> to vector<8x1xf32>
    %cst_1 = arith.constant 3.200000e+01 : f32
    %3 = vector.broadcast %cst_1 : f32 to vector<8x1xf32>
    %4 = arith.divf %2, %3 : vector<8x1xf32>
    %5 = vector.broadcast %4 : vector<8x1xf32> to vector<8x32xf32>
    %6 = arith.subf %0, %5 : vector<8x32xf32>
    %7 = arith.mulf %6, %6 : vector<8x32xf32>
    %cst_2 = arith.constant dense<0.000000e+00> : vector<8xf32>
    %8 = vector.multi_reduction <add>, %7, %cst_2 [1] : vector<8x32xf32> to vector<8xf32>
    %9 = vector.shape_cast %8 : vector<8xf32> to vector<8x1xf32>
    %cst_3 = arith.constant 3.200000e+01 : f32
    %10 = vector.broadcast %cst_3 : f32 to vector<8x1xf32>
    %11 = arith.divf %9, %10 : vector<8x1xf32>
    %12 = vector.broadcast %4 : vector<8x1xf32> to vector<8x32xf32>
    %13 = arith.subf %0, %12 : vector<8x32xf32>
    %cst_4 = arith.constant 9.99999996E-13 : f32
    %14 = vector.broadcast %cst_4 : f32 to vector<8x1xf32>
    %15 = arith.addf %11, %14 : vector<8x1xf32>
    %16 = math.rsqrt %15 : vector<8x1xf32>
    %17 = vector.broadcast %16 : vector<8x1xf32> to vector<8x32xf32>
    %18 = arith.mulf %13, %17 : vector<8x32xf32>
    %c0_5 = arith.constant 0 : index
    %c0_6 = arith.constant 0 : index
    %19 = vector.load %arg3[%c0_5, %c0_6] : memref<1x32xf32, #tpu.memory_space<vmem>>, vector<1x32xf32>
    %20 = vector.broadcast %19 : vector<1x32xf32> to vector<8x32xf32>
    %21 = arith.mulf %18, %20 : vector<8x32xf32>
    %c0_7 = arith.constant 0 : index
    %c0_8 = arith.constant 0 : index
    %22 = vector.load %arg4[%c0_7, %c0_8] : memref<1x32xf32, #tpu.memory_space<vmem>>, vector<1x32xf32>
    %23 = vector.broadcast %22 : vector<1x32xf32> to vector<8x32xf32>
    %24 = arith.addf %21, %23 : vector<8x32xf32>
    %c0_9 = arith.constant 0 : index
    %c0_10 = arith.constant 0 : index
    %25 = vector.load %arg5[%c0_9, %c0_10] : memref<32x128xf32, #tpu.memory_space<vmem>>, vector<32x128xf32>
    %26 = arith.truncf %25 : vector<32x128xf32> to vector<32x128xbf16>
    %27 = arith.truncf %24 : vector<8x32xf32> to vector<8x32xbf16>
    %cst_11 = arith.constant dense<0.000000e+00> : vector<8x128xf32>
    %28 = tpu.matmul %27, %26, %cst_11 {dimension_numbers = #tpu.dot_dimension_numbers<[1], [0], [0], [1], [0, 0, 1, 1], [], []>} : vector<8x32xbf16>, vector<32x128xbf16>, vector<8x128xf32> -> vector<8x128xf32>
    %c0_12 = arith.constant 0 : index
    %c0_13 = arith.constant 0 : index
    %29 = vector.load %arg6[%c0_12, %c0_13] : memref<1x128xf32, #tpu.memory_space<vmem>>, vector<1x128xf32>
    %30 = vector.broadcast %29 : vector<1x128xf32> to vector<8x128xf32>
    %31 = arith.addf %28, %30 : vector<8x128xf32>
    %c0_14 = arith.constant 0 : index
    %c0_15 = arith.constant 0 : index
    %32 = vector.load %arg7[%c0_14, %c0_15] : memref<8x128xf32, #tpu.memory_space<vmem>>, vector<8x128xf32>
    tpu.vector_store %arg7[%c0_14, %c0_15], %31 {strides = array<i32>} : memref<8x128xf32, #tpu.memory_space<vmem>>, vector<8x128xf32>,
    return
  }
  func.func @transform_0(%arg0: i32, %arg1: i32) -> (i32, i32) {
    %c0_i32 = arith.constant 0 : i32
    %c0_i32_0 = arith.constant 0 : i32
    return %arg0, %c0_i32 : i32, i32
  }
  func.func @transform_1(%arg0: i32, %arg1: i32) -> (i32, i32) {
    %c0_i32 = arith.constant 0 : i32
    %c0_i32_0 = arith.constant 0 : i32
    %c0_i32_1 = arith.constant 0 : i32
    return %c0_i32, %c0_i32_0 : i32, i32
  }
  func.func @transform_2(%arg0: i32, %arg1: i32) -> (i32, i32) {
    %c0_i32 = arith.constant 0 : i32
    %c0_i32_0 = arith.constant 0 : i32
    %c0_i32_1 = arith.constant 0 : i32
    return %c0_i32, %c0_i32_0 : i32, i32
  }
  func.func @transform_3(%arg0: i32, %arg1: i32) -> (i32, i32) {
    %c0_i32 = arith.constant 0 : i32
    %c0_i32_0 = arith.constant 0 : i32
    return %c0_i32, %arg1 : i32, i32
  }
  func.func @transform_4(%arg0: i32, %arg1: i32) -> (i32, i32) {
    %c0_i32 = arith.constant 0 : i32
    %c0_i32_0 = arith.constant 0 : i32
    return %c0_i32, %arg1 : i32, i32
  }
  func.func @transform_5(%arg0: i32, %arg1: i32) -> (i32, i32) {
    %c0_i32 = arith.constant 0 : i32
    return %arg0, %arg1 : i32, i32
  }
}

module attributes {stable_mosaic.version = 11 : i64} {
  func.func @_matmul_bias_kernel(%arg0: i32, %arg1: i32, %arg2: memref<8x32xf32, #tpu.memory_space<vmem>>, %arg3: memref<32x128xf32, #tpu.memory_space<vmem>>, %arg4: memref<1x128xf32, #tpu.memory_space<vmem>>, %arg5: memref<8x128xf32, #tpu.memory_space<vmem>>) attributes {dimension_semantics = [#tpu.dimension_semantics<parallel>, #tpu.dimension_semantics<parallel>], iteration_bounds = array<i64: 1, 1>, scalar_prefetch = 0 : i64, scratch_operands = 0 : i64, tpu.core_type = #tpu.core_type<tc>, window_params = [{transform_indices = @transform_0, window_bounds = array<i64: 8, 32>}, {transform_indices = @transform_1, window_bounds = array<i64: 32, 128>}, {transform_indices = @transform_2, window_bounds = array<i64: 1, 128>}, {transform_indices = @transform_3, window_bounds = array<i64: 8, 128>}]} {
    %c0 = arith.constant 0 : index
    %c0_0 = arith.constant 0 : index
    %0 = vector.load %arg2[%c0, %c0_0] : memref<8x32xf32, #tpu.memory_space<vmem>>, vector<8x32xf32>
    %1 = arith.truncf %0 : vector<8x32xf32> to vector<8x32xbf16>
    %c0_1 = arith.constant 0 : index
    %c0_2 = arith.constant 0 : index
    %2 = vector.load %arg3[%c0_1, %c0_2] : memref<32x128xf32, #tpu.memory_space<vmem>>, vector<32x128xf32>
    %3 = arith.truncf %2 : vector<32x128xf32> to vector<32x128xbf16>
    %cst = arith.constant dense<0.000000e+00> : vector<8x128xf32>
    %4 = tpu.matmul %1, %3, %cst {dimension_numbers = #tpu.dot_dimension_numbers<[1], [0], [0], [1], [0, 0, 1, 1], [], []>} : vector<8x32xbf16>, vector<32x128xbf16>, vector<8x128xf32> -> vector<8x128xf32>
    %c0_3 = arith.constant 0 : index
    %c0_4 = arith.constant 0 : index
    %5 = vector.load %arg4[%c0_3, %c0_4] : memref<1x128xf32, #tpu.memory_space<vmem>>, vector<1x128xf32>
    %6 = vector.broadcast %5 : vector<1x128xf32> to vector<8x128xf32>
    %7 = arith.addf %4, %6 : vector<8x128xf32>
    %c0_5 = arith.constant 0 : index
    %c0_6 = arith.constant 0 : index
    %8 = vector.load %arg5[%c0_5, %c0_6] : memref<8x128xf32, #tpu.memory_space<vmem>>, vector<8x128xf32>
    tpu.vector_store %arg5[%c0_5, %c0_6], %7 {strides = array<i32>} : memref<8x128xf32, #tpu.memory_space<vmem>>, vector<8x128xf32>,
    return
  }
  func.func @transform_0(%arg0: i32, %arg1: i32) -> (i32, i32) {
    %c0_i32 = arith.constant 0 : i32
    %c0_i32_0 = arith.constant 0 : i32
    return %arg0, %c0_i32 : i32, i32
  }
  func.func @transform_1(%arg0: i32, %arg1: i32) -> (i32, i32) {
    %c0_i32 = arith.constant 0 : i32
    %c0_i32_0 = arith.constant 0 : i32
    return %c0_i32, %arg1 : i32, i32
  }
  func.func @transform_2(%arg0: i32, %arg1: i32) -> (i32, i32) {
    %c0_i32 = arith.constant 0 : i32
    %c0_i32_0 = arith.constant 0 : i32
    return %c0_i32, %arg1 : i32, i32
  }
  func.func @transform_3(%arg0: i32, %arg1: i32) -> (i32, i32) {
    %c0_i32 = arith.constant 0 : i32
    return %arg0, %arg1 : i32, i32
  }
}

module attributes {stable_mosaic.version = 11 : i64} {
  func.func @_attn_kernel(%arg0: i32, %arg1: memref<1x3x96xf32, #tpu.memory_space<vmem>>, %arg2: memref<1x1x3xf32, #tpu.memory_space<vmem>>, %arg3: memref<1x3x32xf32, #tpu.memory_space<vmem>>) attributes {dimension_semantics = [#tpu.dimension_semantics<parallel>], iteration_bounds = array<i64: 2>, scalar_prefetch = 0 : i64, scratch_operands = 0 : i64, tpu.core_type = #tpu.core_type<tc>, window_params = [{transform_indices = @transform_0, window_bounds = array<i64: 1, 3, 96>}, {transform_indices = @transform_1, window_bounds = array<i64: 1, 1, 3>}, {transform_indices = @transform_2, window_bounds = array<i64: 1, 3, 32>}]} {
    %c0 = arith.constant 0 : index
    %c0_0 = arith.constant 0 : index
    %c0_1 = arith.constant 0 : index
    %0 = vector.load %arg1[%c0, %c0_0, %c0_1] : memref<1x3x96xf32, #tpu.memory_space<vmem>>, vector<1x3x96xf32>
    %1 = vector.shape_cast %0 : vector<1x3x96xf32> to vector<3x96xf32>
    %c0_2 = arith.constant 0 : index
    %c0_3 = arith.constant 0 : index
    %c0_4 = arith.constant 0 : index
    %2 = vector.load %arg2[%c0_2, %c0_3, %c0_4] : memref<1x1x3xf32, #tpu.memory_space<vmem>>, vector<1x1x3xf32>
    %3 = vector.shape_cast %2 : vector<1x1x3xf32> to vector<1x3xf32>
    %4 = vector.extract_strided_slice %1 {offsets = [0, 0], sizes = [3, 32], strides = [1, 1]} : vector<3x96xf32> to vector<3x32xf32>
    %5 = vector.extract_strided_slice %1 {offsets = [0, 32], sizes = [3, 32], strides = [1, 1]} : vector<3x96xf32> to vector<3x32xf32>
    %6 = vector.extract_strided_slice %1 {offsets = [0, 64], sizes = [3, 32], strides = [1, 1]} : vector<3x96xf32> to vector<3x32xf32>
    %7 = vector.extract_strided_slice %4 {offsets = [0, 0], sizes = [3, 8], strides = [1, 1]} : vector<3x32xf32> to vector<3x8xf32>
    %8 = arith.truncf %7 : vector<3x8xf32> to vector<3x8xbf16>
    %9 = vector.extract_strided_slice %5 {offsets = [0, 0], sizes = [3, 8], strides = [1, 1]} : vector<3x32xf32> to vector<3x8xf32>
    %10 = arith.truncf %9 : vector<3x8xf32> to vector<3x8xbf16>
    %11 = vector.extract_strided_slice %6 {offsets = [0, 0], sizes = [3, 8], strides = [1, 1]} : vector<3x32xf32> to vector<3x8xf32>
    %12 = arith.truncf %11 : vector<3x8xf32> to vector<3x8xbf16>
    %cst = arith.constant dense<0.000000e+00> : vector<3x3xf32>
    %13 = tpu.matmul %8, %10, %cst {dimension_numbers = #tpu.dot_dimension_numbers<[1], [1], [0], [0], [0, 0, 1, 0], [], []>} : vector<3x8xbf16>, vector<3x8xbf16>, vector<3x3xf32> -> vector<3x3xf32>
    %cst_5 = arith.constant 0.353553385 : f32
    %14 = vector.broadcast %cst_5 : f32 to vector<3x3xf32>
    %15 = arith.mulf %13, %14 : vector<3x3xf32>
    %cst_6 = arith.constant 0.000000e+00 : f32
    %16 = vector.broadcast %cst_6 : f32 to vector<1x3xf32>
    %17 = arith.cmpf ogt, %3, %16 : vector<1x3xf32>
    %cst_7 = arith.constant -3.40282347E+38 : f32
    %18 = vector.shape_cast %17 : vector<1x3xi1> to vector<1x3xi1>
    %19 = vector.broadcast %18 : vector<1x3xi1> to vector<3x3xi1>
    %20 = vector.broadcast %cst_7 : f32 to vector<3x3xf32>
    %21 = arith.select %19, %15, %20 : vector<3x3xi1>, vector<3x3xf32>
    %cst_8 = arith.constant dense<0xFF800000> : vector<3xf32>
    %22 = vector.multi_reduction <maximumf>, %21, %cst_8 [1] : vector<3x3xf32> to vector<3xf32>
    %23 = vector.shape_cast %22 : vector<3xf32> to vector<3x1xf32>
    %24 = vector.broadcast %23 : vector<3x1xf32> to vector<3x3xf32>
    %25 = arith.subf %21, %24 : vector<3x3xf32>
    %26 = math.exp %25 : vector<3x3xf32>
    %cst_9 = arith.constant dense<0.000000e+00> : vector<3xf32>
    %27 = vector.multi_reduction <add>, %26, %cst_9 [1] : vector<3x3xf32> to vector<3xf32>
    %28 = vector.shape_cast %27 : vector<3xf32> to vector<3x1xf32>
    %29 = tpu.reciprocal %28 {approx = true} : vector<3x1xf32> -> vector<3x1xf32>
    %cst_10 = arith.constant 0.000000e+00 : f32
    %30 = vector.broadcast %cst_10 : f32 to vector<1x3xf32>
    %31 = arith.cmpf ogt, %3, %30 : vector<1x3xf32>
    %32 = vector.broadcast %29 : vector<3x1xf32> to vector<3x3xf32>
    %33 = arith.mulf %26, %32 : vector<3x3xf32>
    %cst_11 = arith.constant 0.000000e+00 : f32
    %34 = vector.shape_cast %31 : vector<1x3xi1> to vector<1x3xi1>
    %35 = vector.broadcast %34 : vector<1x3xi1> to vector<3x3xi1>
    %36 = vector.broadcast %cst_11 : f32 to vector<3x3xf32>
    %37 = arith.select %35, %33, %36 : vector<3x3xi1>, vector<3x3xf32>
    %38 = arith.truncf %37 : vector<3x3xf32> to vector<3x3xbf16>
    %cst_12 = arith.constant dense<0.000000e+00> : vector<3x8xf32>
    %39 = tpu.matmul %38, %12, %cst_12 {dimension_numbers = #tpu.dot_dimension_numbers<[1], [0], [0], [1], [0, 0, 1, 1], [], []>} : vector<3x3xbf16>, vector<3x8xbf16>, vector<3x8xf32> -> vector<3x8xf32>
    %40 = vector.extract_strided_slice %4 {offsets = [0, 8], sizes = [3, 8], strides = [1, 1]} : vector<3x32xf32> to vector<3x8xf32>
    %41 = arith.truncf %40 : vector<3x8xf32> to vector<3x8xbf16>
    %42 = vector.extract_strided_slice %5 {offsets = [0, 8], sizes = [3, 8], strides = [1, 1]} : vector<3x32xf32> to vector<3x8xf32>
    %43 = arith.truncf %42 : vector<3x8xf32> to vector<3x8xbf16>
    %44 = vector.extract_strided_slice %6 {offsets = [0, 8], sizes = [3, 8], strides = [1, 1]} : vector<3x32xf32> to vector<3x8xf32>
    %45 = arith.truncf %44 : vector<3x8xf32> to vector<3x8xbf16>
    %cst_13 = arith.constant dense<0.000000e+00> : vector<3x3xf32>
    %46 = tpu.matmul %41, %43, %cst_13 {dimension_numbers = #tpu.dot_dimension_numbers<[1], [1], [0], [0], [0, 0, 1, 0], [], []>} : vector<3x8xbf16>, vector<3x8xbf16>, vector<3x3xf32> -> vector<3x3xf32>
    %cst_14 = arith.constant 0.353553385 : f32
    %47 = vector.broadcast %cst_14 : f32 to vector<3x3xf32>
    %48 = arith.mulf %46, %47 : vector<3x3xf32>
    %cst_15 = arith.constant 0.000000e+00 : f32
    %49 = vector.broadcast %cst_15 : f32 to vector<1x3xf32>
    %50 = arith.cmpf ogt, %3, %49 : vector<1x3xf32>
    %cst_16 = arith.constant -3.40282347E+38 : f32
    %51 = vector.shape_cast %50 : vector<1x3xi1> to vector<1x3xi1>
    %52 = vector.broadcast %51 : vector<1x3xi1> to vector<3x3xi1>
    %53 = vector.broadcast %cst_16 : f32 to vector<3x3xf32>
    %54 = arith.select %52, %48, %53 : vector<3x3xi1>, vector<3x3xf32>
    %cst_17 = arith.constant dense<0xFF800000> : vector<3xf32>
    %55 = vector.multi_reduction <maximumf>, %54, %cst_17 [1] : vector<3x3xf32> to vector<3xf32>
    %56 = vector.shape_cast %55 : vector<3xf32> to vector<3x1xf32>
    %57 = vector.broadcast %56 : vector<3x1xf32> to vector<3x3xf32>
    %58 = arith.subf %54, %57 : vector<3x3xf32>
    %59 = math.exp %58 : vector<3x3xf32>
    %cst_18 = arith.constant dense<0.000000e+00> : vector<3xf32>
    %60 = vector.multi_reduction <add>, %59, %cst_18 [1] : vector<3x3xf32> to vector<3xf32>
    %61 = vector.shape_cast %60 : vector<3xf32> to vector<3x1xf32>
    %62 = tpu.reciprocal %61 {approx = true} : vector<3x1xf32> -> vector<3x1xf32>
    %cst_19 = arith.constant 0.000000e+00 : f32
    %63 = vector.broadcast %cst_19 : f32 to vector<1x3xf32>
    %64 = arith.cmpf ogt, %3, %63 : vector<1x3xf32>
    %65 = vector.broadcast %62 : vector<3x1xf32> to vector<3x3xf32>
    %66 = arith.mulf %59, %65 : vector<3x3xf32>
    %cst_20 = arith.constant 0.000000e+00 : f32
    %67 = vector.shape_cast %64 : vector<1x3xi1> to vector<1x3xi1>
    %68 = vector.broadcast %67 : vector<1x3xi1> to vector<3x3xi1>
    %69 = vector.broadcast %cst_20 : f32 to vector<3x3xf32>
    %70 = arith.select %68, %66, %69 : vector<3x3xi1>, vector<3x3xf32>
    %71 = arith.truncf %70 : vector<3x3xf32> to vector<3x3xbf16>
    %cst_21 = arith.constant dense<0.000000e+00> : vector<3x8xf32>
    %72 = tpu.matmul %71, %45, %cst_21 {dimension_numbers = #tpu.dot_dimension_numbers<[1], [0], [0], [1], [0, 0, 1, 1], [], []>} : vector<3x3xbf16>, vector<3x8xbf16>, vector<3x8xf32> -> vector<3x8xf32>
    %73 = vector.extract_strided_slice %4 {offsets = [0, 16], sizes = [3, 8], strides = [1, 1]} : vector<3x32xf32> to vector<3x8xf32>
    %74 = arith.truncf %73 : vector<3x8xf32> to vector<3x8xbf16>
    %75 = vector.extract_strided_slice %5 {offsets = [0, 16], sizes = [3, 8], strides = [1, 1]} : vector<3x32xf32> to vector<3x8xf32>
    %76 = arith.truncf %75 : vector<3x8xf32> to vector<3x8xbf16>
    %77 = vector.extract_strided_slice %6 {offsets = [0, 16], sizes = [3, 8], strides = [1, 1]} : vector<3x32xf32> to vector<3x8xf32>
    %78 = arith.truncf %77 : vector<3x8xf32> to vector<3x8xbf16>
    %cst_22 = arith.constant dense<0.000000e+00> : vector<3x3xf32>
    %79 = tpu.matmul %74, %76, %cst_22 {dimension_numbers = #tpu.dot_dimension_numbers<[1], [1], [0], [0], [0, 0, 1, 0], [], []>} : vector<3x8xbf16>, vector<3x8xbf16>, vector<3x3xf32> -> vector<3x3xf32>
    %cst_23 = arith.constant 0.353553385 : f32
    %80 = vector.broadcast %cst_23 : f32 to vector<3x3xf32>
    %81 = arith.mulf %79, %80 : vector<3x3xf32>
    %cst_24 = arith.constant 0.000000e+00 : f32
    %82 = vector.broadcast %cst_24 : f32 to vector<1x3xf32>
    %83 = arith.cmpf ogt, %3, %82 : vector<1x3xf32>
    %cst_25 = arith.constant -3.40282347E+38 : f32
    %84 = vector.shape_cast %83 : vector<1x3xi1> to vector<1x3xi1>
    %85 = vector.broadcast %84 : vector<1x3xi1> to vector<3x3xi1>
    %86 = vector.broadcast %cst_25 : f32 to vector<3x3xf32>
    %87 = arith.select %85, %81, %86 : vector<3x3xi1>, vector<3x3xf32>
    %cst_26 = arith.constant dense<0xFF800000> : vector<3xf32>
    %88 = vector.multi_reduction <maximumf>, %87, %cst_26 [1] : vector<3x3xf32> to vector<3xf32>
    %89 = vector.shape_cast %88 : vector<3xf32> to vector<3x1xf32>
    %90 = vector.broadcast %89 : vector<3x1xf32> to vector<3x3xf32>
    %91 = arith.subf %87, %90 : vector<3x3xf32>
    %92 = math.exp %91 : vector<3x3xf32>
    %cst_27 = arith.constant dense<0.000000e+00> : vector<3xf32>
    %93 = vector.multi_reduction <add>, %92, %cst_27 [1] : vector<3x3xf32> to vector<3xf32>
    %94 = vector.shape_cast %93 : vector<3xf32> to vector<3x1xf32>
    %95 = tpu.reciprocal %94 {approx = true} : vector<3x1xf32> -> vector<3x1xf32>
    %cst_28 = arith.constant 0.000000e+00 : f32
    %96 = vector.broadcast %cst_28 : f32 to vector<1x3xf32>
    %97 = arith.cmpf ogt, %3, %96 : vector<1x3xf32>
    %98 = vector.broadcast %95 : vector<3x1xf32> to vector<3x3xf32>
    %99 = arith.mulf %92, %98 : vector<3x3xf32>
    %cst_29 = arith.constant 0.000000e+00 : f32
    %100 = vector.shape_cast %97 : vector<1x3xi1> to vector<1x3xi1>
    %101 = vector.broadcast %100 : vector<1x3xi1> to vector<3x3xi1>
    %102 = vector.broadcast %cst_29 : f32 to vector<3x3xf32>
    %103 = arith.select %101, %99, %102 : vector<3x3xi1>, vector<3x3xf32>
    %104 = arith.truncf %103 : vector<3x3xf32> to vector<3x3xbf16>
    %cst_30 = arith.constant dense<0.000000e+00> : vector<3x8xf32>
    %105 = tpu.matmul %104, %78, %cst_30 {dimension_numbers = #tpu.dot_dimension_numbers<[1], [0], [0], [1], [0, 0, 1, 1], [], []>} : vector<3x3xbf16>, vector<3x8xbf16>, vector<3x8xf32> -> vector<3x8xf32>
    %106 = vector.extract_strided_slice %4 {offsets = [0, 24], sizes = [3, 8], strides = [1, 1]} : vector<3x32xf32> to vector<3x8xf32>
    %107 = arith.truncf %106 : vector<3x8xf32> to vector<3x8xbf16>
    %108 = vector.extract_strided_slice %5 {offsets = [0, 24], sizes = [3, 8], strides = [1, 1]} : vector<3x32xf32> to vector<3x8xf32>
    %109 = arith.truncf %108 : vector<3x8xf32> to vector<3x8xbf16>
    %110 = vector.extract_strided_slice %6 {offsets = [0, 24], sizes = [3, 8], strides = [1, 1]} : vector<3x32xf32> to vector<3x8xf32>
    %111 = arith.truncf %110 : vector<3x8xf32> to vector<3x8xbf16>
    %cst_31 = arith.constant dense<0.000000e+00> : vector<3x3xf32>
    %112 = tpu.matmul %107, %109, %cst_31 {dimension_numbers = #tpu.dot_dimension_numbers<[1], [1], [0], [0], [0, 0, 1, 0], [], []>} : vector<3x8xbf16>, vector<3x8xbf16>, vector<3x3xf32> -> vector<3x3xf32>
    %cst_32 = arith.constant 0.353553385 : f32
    %113 = vector.broadcast %cst_32 : f32 to vector<3x3xf32>
    %114 = arith.mulf %112, %113 : vector<3x3xf32>
    %cst_33 = arith.constant 0.000000e+00 : f32
    %115 = vector.broadcast %cst_33 : f32 to vector<1x3xf32>
    %116 = arith.cmpf ogt, %3, %115 : vector<1x3xf32>
    %cst_34 = arith.constant -3.40282347E+38 : f32
    %117 = vector.shape_cast %116 : vector<1x3xi1> to vector<1x3xi1>
    %118 = vector.broadcast %117 : vector<1x3xi1> to vector<3x3xi1>
    %119 = vector.broadcast %cst_34 : f32 to vector<3x3xf32>
    %120 = arith.select %118, %114, %119 : vector<3x3xi1>, vector<3x3xf32>
    %cst_35 = arith.constant dense<0xFF800000> : vector<3xf32>
    %121 = vector.multi_reduction <maximumf>, %120, %cst_35 [1] : vector<3x3xf32> to vector<3xf32>
    %122 = vector.shape_cast %121 : vector<3xf32> to vector<3x1xf32>
    %123 = vector.broadcast %122 : vector<3x1xf32> to vector<3x3xf32>
    %124 = arith.subf %120, %123 : vector<3x3xf32>
    %125 = math.exp %124 : vector<3x3xf32>
    %cst_36 = arith.constant dense<0.000000e+00> : vector<3xf32>
    %126 = vector.multi_reduction <add>, %125, %cst_36 [1] : vector<3x3xf32> to vector<3xf32>
    %127 = vector.shape_cast %126 : vector<3xf32> to vector<3x1xf32>
    %128 = tpu.reciprocal %127 {approx = true} : vector<3x1xf32> -> vector<3x1xf32>
    %cst_37 = arith.constant 0.000000e+00 : f32
    %129 = vector.broadcast %cst_37 : f32 to vector<1x3xf32>
    %130 = arith.cmpf ogt, %3, %129 : vector<1x3xf32>
    %131 = vector.broadcast %128 : vector<3x1xf32> to vector<3x3xf32>
    %132 = arith.mulf %125, %131 : vector<3x3xf32>
    %cst_38 = arith.constant 0.000000e+00 : f32
    %133 = vector.shape_cast %130 : vector<1x3xi1> to vector<1x3xi1>
    %134 = vector.broadcast %133 : vector<1x3xi1> to vector<3x3xi1>
    %135 = vector.broadcast %cst_38 : f32 to vector<3x3xf32>
    %136 = arith.select %134, %132, %135 : vector<3x3xi1>, vector<3x3xf32>
    %137 = arith.truncf %136 : vector<3x3xf32> to vector<3x3xbf16>
    %cst_39 = arith.constant dense<0.000000e+00> : vector<3x8xf32>
    %138 = tpu.matmul %137, %111, %cst_39 {dimension_numbers = #tpu.dot_dimension_numbers<[1], [0], [0], [1], [0, 0, 1, 1], [], []>} : vector<3x3xbf16>, vector<3x8xbf16>, vector<3x8xf32> -> vector<3x8xf32>
    %139 = tpu.concatenate %39, %72, %105, %138 in 1 : vector<3x8xf32>, vector<3x8xf32>, vector<3x8xf32>, vector<3x8xf32> -> vector<3x32xf32>
    %c0_40 = arith.constant 0 : index
    %c0_41 = arith.constant 0 : index
    %c0_42 = arith.constant 0 : index
    %140 = vector.load %arg3[%c0_40, %c0_41, %c0_42] : memref<1x3x32xf32, #tpu.memory_space<vmem>>, vector<1x3x32xf32>
    %141 = vector.shape_cast %140 : vector<1x3x32xf32> to vector<3x32xf32>
    %142 = vector.shape_cast %139 : vector<3x32xf32> to vector<1x3x32xf32>
    tpu.vector_store %arg3[%c0_40, %c0_41, %c0_42], %142 {strides = array<i32>} : memref<1x3x32xf32, #tpu.memory_space<vmem>>, vector<1x3x32xf32>,
    return
  }
  func.func @transform_0(%arg0: i32) -> (i32, i32, i32) {
    %c0_i32 = arith.constant 0 : i32
    %c0_i32_0 = arith.constant 0 : i32
    %c0_i32_1 = arith.constant 0 : i32
    return %arg0, %c0_i32, %c0_i32_0 : i32, i32, i32
  }
  func.func @transform_1(%arg0: i32) -> (i32, i32, i32) {
    %c0_i32 = arith.constant 0 : i32
    %c0_i32_0 = arith.constant 0 : i32
    %c0_i32_1 = arith.constant 0 : i32
    return %arg0, %c0_i32, %c0_i32_0 : i32, i32, i32
  }
  func.func @transform_2(%arg0: i32) -> (i32, i32, i32) {
    %c0_i32 = arith.constant 0 : i32
    %c0_i32_0 = arith.constant 0 : i32
    %c0_i32_1 = arith.constant 0 : i32
    return %arg0, %c0_i32, %c0_i32_0 : i32, i32, i32
  }
}

module attributes {stable_mosaic.version = 11 : i64} {
  func.func @_ln_ffn_kernel(%arg0: i32, %arg1: memref<8x32xf32, #tpu.memory_space<vmem>>, %arg2: memref<1x32xf32, #tpu.memory_space<vmem>>, %arg3: memref<1x32xf32, #tpu.memory_space<vmem>>, %arg4: memref<32x64xf32, #tpu.memory_space<vmem>>, %arg5: memref<1x64xf32, #tpu.memory_space<vmem>>, %arg6: memref<64x32xf32, #tpu.memory_space<vmem>>, %arg7: memref<1x32xf32, #tpu.memory_space<vmem>>, %arg8: memref<8x32xf32, #tpu.memory_space<vmem>>) attributes {dimension_semantics = [#tpu.dimension_semantics<parallel>], iteration_bounds = array<i64: 1>, scalar_prefetch = 0 : i64, scratch_operands = 0 : i64, tpu.core_type = #tpu.core_type<tc>, window_params = [{transform_indices = @transform_0, window_bounds = array<i64: 8, 32>}, {pipeline_mode = #tpu.pipeline_mode<synchronous>, transform_indices = @transform_1, window_bounds = array<i64: 1, 32>}, {pipeline_mode = #tpu.pipeline_mode<synchronous>, transform_indices = @transform_2, window_bounds = array<i64: 1, 32>}, {pipeline_mode = #tpu.pipeline_mode<synchronous>, transform_indices = @transform_3, window_bounds = array<i64: 32, 64>}, {pipeline_mode = #tpu.pipeline_mode<synchronous>, transform_indices = @transform_4, window_bounds = array<i64: 1, 64>}, {pipeline_mode = #tpu.pipeline_mode<synchronous>, transform_indices = @transform_5, window_bounds = array<i64: 64, 32>}, {pipeline_mode = #tpu.pipeline_mode<synchronous>, transform_indices = @transform_6, window_bounds = array<i64: 1, 32>}, {transform_indices = @transform_7, window_bounds = array<i64: 8, 32>}]} {
    %c0 = arith.constant 0 : index
    %c0_0 = arith.constant 0 : index
    %0 = vector.load %arg1[%c0, %c0_0] : memref<8x32xf32, #tpu.memory_space<vmem>>, vector<8x32xf32>
    %cst = arith.constant dense<0.000000e+00> : vector<8xf32>
    %1 = vector.multi_reduction <add>, %0, %cst [1] : vector<8x32xf32> to vector<8xf32>
    %2 = vector.shape_cast %1 : vector<8xf32> to vector<8x1xf32>
    %cst_1 = arith.constant 3.200000e+01 : f32
    %3 = vector.broadcast %cst_1 : f32 to vector<8x1xf32>
    %4 = arith.divf %2, %3 : vector<8x1xf32>
    %5 = vector.broadcast %4 : vector<8x1xf32> to vector<8x32xf32>
    %6 = arith.subf %0, %5 : vector<8x32xf32>
    %7 = arith.mulf %6, %6 : vector<8x32xf32>
    %cst_2 = arith.constant dense<0.000000e+00> : vector<8xf32>
    %8 = vector.multi_reduction <add>, %7, %cst_2 [1] : vector<8x32xf32> to vector<8xf32>
    %9 = vector.shape_cast %8 : vector<8xf32> to vector<8x1xf32>
    %cst_3 = arith.constant 3.200000e+01 : f32
    %10 = vector.broadcast %cst_3 : f32 to vector<8x1xf32>
    %11 = arith.divf %9, %10 : vector<8x1xf32>
    %12 = vector.broadcast %4 : vector<8x1xf32> to vector<8x32xf32>
    %13 = arith.subf %0, %12 : vector<8x32xf32>
    %cst_4 = arith.constant 9.99999996E-13 : f32
    %14 = vector.broadcast %cst_4 : f32 to vector<8x1xf32>
    %15 = arith.addf %11, %14 : vector<8x1xf32>
    %16 = math.rsqrt %15 : vector<8x1xf32>
    %17 = vector.broadcast %16 : vector<8x1xf32> to vector<8x32xf32>
    %18 = arith.mulf %13, %17 : vector<8x32xf32>
    %c0_5 = arith.constant 0 : index
    %c0_6 = arith.constant 0 : index
    %19 = vector.load %arg2[%c0_5, %c0_6] : memref<1x32xf32, #tpu.memory_space<vmem>>, vector<1x32xf32>
    %20 = vector.broadcast %19 : vector<1x32xf32> to vector<8x32xf32>
    %21 = arith.mulf %18, %20 : vector<8x32xf32>
    %c0_7 = arith.constant 0 : index
    %c0_8 = arith.constant 0 : index
    %22 = vector.load %arg3[%c0_7, %c0_8] : memref<1x32xf32, #tpu.memory_space<vmem>>, vector<1x32xf32>
    %23 = vector.broadcast %22 : vector<1x32xf32> to vector<8x32xf32>
    %24 = arith.addf %21, %23 : vector<8x32xf32>
    %25 = arith.truncf %24 : vector<8x32xf32> to vector<8x32xbf16>
    %c0_9 = arith.constant 0 : index
    %c0_10 = arith.constant 0 : index
    %26 = vector.load %arg4[%c0_9, %c0_10] : memref<32x64xf32, #tpu.memory_space<vmem>>, vector<32x64xf32>
    %27 = arith.truncf %26 : vector<32x64xf32> to vector<32x64xbf16>
    %cst_11 = arith.constant dense<0.000000e+00> : vector<8x64xf32>
    %28 = tpu.matmul %25, %27, %cst_11 {dimension_numbers = #tpu.dot_dimension_numbers<[1], [0], [0], [1], [0, 0, 1, 1], [], []>} : vector<8x32xbf16>, vector<32x64xbf16>, vector<8x64xf32> -> vector<8x64xf32>
    %c0_12 = arith.constant 0 : index
    %c0_13 = arith.constant 0 : index
    %29 = vector.load %arg5[%c0_12, %c0_13] : memref<1x64xf32, #tpu.memory_space<vmem>>, vector<1x64xf32>
    %30 = vector.broadcast %29 : vector<1x64xf32> to vector<8x64xf32>
    %31 = arith.addf %28, %30 : vector<8x64xf32>
    %cst_14 = arith.constant 0.000000e+00 : f32
    %32 = vector.broadcast %cst_14 : f32 to vector<8x64xf32>
    %33 = arith.maximumf %31, %32 : vector<8x64xf32>
    %34 = arith.truncf %33 : vector<8x64xf32> to vector<8x64xbf16>
    %c0_15 = arith.constant 0 : index
    %c0_16 = arith.constant 0 : index
    %35 = vector.load %arg6[%c0_15, %c0_16] : memref<64x32xf32, #tpu.memory_space<vmem>>, vector<64x32xf32>
    %36 = arith.truncf %35 : vector<64x32xf32> to vector<64x32xbf16>
    %cst_17 = arith.constant dense<0.000000e+00> : vector<8x32xf32>
    %37 = tpu.matmul %34, %36, %cst_17 {dimension_numbers = #tpu.dot_dimension_numbers<[1], [0], [0], [1], [0, 0, 1, 1], [], []>} : vector<8x64xbf16>, vector<64x32xbf16>, vector<8x32xf32> -> vector<8x32xf32>
    %c0_18 = arith.constant 0 : index
    %c0_19 = arith.constant 0 : index
    %38 = vector.load %arg7[%c0_18, %c0_19] : memref<1x32xf32, #tpu.memory_space<vmem>>, vector<1x32xf32>
    %39 = vector.broadcast %38 : vector<1x32xf32> to vector<8x32xf32>
    %40 = arith.addf %37, %39 : vector<8x32xf32>
    %c0_20 = arith.constant 0 : index
    %c0_21 = arith.constant 0 : index
    %41 = vector.load %arg8[%c0_20, %c0_21] : memref<8x32xf32, #tpu.memory_space<vmem>>, vector<8x32xf32>
    tpu.vector_store %arg8[%c0_20, %c0_21], %40 {strides = array<i32>} : memref<8x32xf32, #tpu.memory_space<vmem>>, vector<8x32xf32>,
    return
  }
  func.func @transform_0(%arg0: i32) -> (i32, i32) {
    %c0_i32 = arith.constant 0 : i32
    %c0_i32_0 = arith.constant 0 : i32
    return %arg0, %c0_i32 : i32, i32
  }
  func.func @transform_1(%arg0: i32) -> (i32, i32) {
    %c0_i32 = arith.constant 0 : i32
    %c0_i32_0 = arith.constant 0 : i32
    %c0_i32_1 = arith.constant 0 : i32
    return %c0_i32, %c0_i32_0 : i32, i32
  }
  func.func @transform_2(%arg0: i32) -> (i32, i32) {
    %c0_i32 = arith.constant 0 : i32
    %c0_i32_0 = arith.constant 0 : i32
    %c0_i32_1 = arith.constant 0 : i32
    return %c0_i32, %c0_i32_0 : i32, i32
  }
  func.func @transform_3(%arg0: i32) -> (i32, i32) {
    %c0_i32 = arith.constant 0 : i32
    %c0_i32_0 = arith.constant 0 : i32
    %c0_i32_1 = arith.constant 0 : i32
    return %c0_i32, %c0_i32_0 : i32, i32
  }
  func.func @transform_4(%arg0: i32) -> (i32, i32) {
    %c0_i32 = arith.constant 0 : i32
    %c0_i32_0 = arith.constant 0 : i32
    %c0_i32_1 = arith.constant 0 : i32
    return %c0_i32, %c0_i32_0 : i32, i32
  }
  func.func @transform_5(%arg0: i32) -> (i32, i32) {
    %c0_i32 = arith.constant 0 : i32
    %c0_i32_0 = arith.constant 0 : i32
    %c0_i32_1 = arith.constant 0 : i32
    return %c0_i32, %c0_i32_0 : i32, i32
  }
  func.func @transform_6(%arg0: i32) -> (i32, i32) {
    %c0_i32 = arith.constant 0 : i32
    %c0_i32_0 = arith.constant 0 : i32
    %c0_i32_1 = arith.constant 0 : i32
    return %c0_i32, %c0_i32_0 : i32, i32
  }
  func.func @transform_7(%arg0: i32) -> (i32, i32) {
    %c0_i32 = arith.constant 0 : i32
    %c0_i32_0 = arith.constant 0 : i32
    return %arg0, %c0_i32 : i32, i32
  }
}

module attributes {stable_mosaic.version = 11 : i64} {
  func.func @_layernorm_kernel(%arg0: i32, %arg1: memref<8x32xf32, #tpu.memory_space<vmem>>, %arg2: memref<1x32xf32, #tpu.memory_space<vmem>>, %arg3: memref<1x32xf32, #tpu.memory_space<vmem>>, %arg4: memref<8x32xf32, #tpu.memory_space<vmem>>) attributes {dimension_semantics = [#tpu.dimension_semantics<parallel>], iteration_bounds = array<i64: 1>, scalar_prefetch = 0 : i64, scratch_operands = 0 : i64, tpu.core_type = #tpu.core_type<tc>, window_params = [{transform_indices = @transform_0, window_bounds = array<i64: 8, 32>}, {pipeline_mode = #tpu.pipeline_mode<synchronous>, transform_indices = @transform_1, window_bounds = array<i64: 1, 32>}, {pipeline_mode = #tpu.pipeline_mode<synchronous>, transform_indices = @transform_2, window_bounds = array<i64: 1, 32>}, {transform_indices = @transform_3, window_bounds = array<i64: 8, 32>}]} {
    %c0 = arith.constant 0 : index
    %c0_0 = arith.constant 0 : index
    %0 = vector.load %arg1[%c0, %c0_0] : memref<8x32xf32, #tpu.memory_space<vmem>>, vector<8x32xf32>
    %cst = arith.constant dense<0.000000e+00> : vector<8xf32>
    %1 = vector.multi_reduction <add>, %0, %cst [1] : vector<8x32xf32> to vector<8xf32>
    %2 = vector.shape_cast %1 : vector<8xf32> to vector<8x1xf32>
    %cst_1 = arith.constant 3.200000e+01 : f32
    %3 = vector.broadcast %cst_1 : f32 to vector<8x1xf32>
    %4 = arith.divf %2, %3 : vector<8x1xf32>
    %5 = vector.broadcast %4 : vector<8x1xf32> to vector<8x32xf32>
    %6 = arith.subf %0, %5 : vector<8x32xf32>
    %7 = arith.mulf %6, %6 : vector<8x32xf32>
    %cst_2 = arith.constant dense<0.000000e+00> : vector<8xf32>
    %8 = vector.multi_reduction <add>, %7, %cst_2 [1] : vector<8x32xf32> to vector<8xf32>
    %9 = vector.shape_cast %8 : vector<8xf32> to vector<8x1xf32>
    %cst_3 = arith.constant 3.200000e+01 : f32
    %10 = vector.broadcast %cst_3 : f32 to vector<8x1xf32>
    %11 = arith.divf %9, %10 : vector<8x1xf32>
    %12 = vector.broadcast %4 : vector<8x1xf32> to vector<8x32xf32>
    %13 = arith.subf %0, %12 : vector<8x32xf32>
    %cst_4 = arith.constant 9.99999996E-13 : f32
    %14 = vector.broadcast %cst_4 : f32 to vector<8x1xf32>
    %15 = arith.addf %11, %14 : vector<8x1xf32>
    %16 = math.rsqrt %15 : vector<8x1xf32>
    %17 = vector.broadcast %16 : vector<8x1xf32> to vector<8x32xf32>
    %18 = arith.mulf %13, %17 : vector<8x32xf32>
    %c0_5 = arith.constant 0 : index
    %c0_6 = arith.constant 0 : index
    %19 = vector.load %arg2[%c0_5, %c0_6] : memref<1x32xf32, #tpu.memory_space<vmem>>, vector<1x32xf32>
    %20 = vector.broadcast %19 : vector<1x32xf32> to vector<8x32xf32>
    %21 = arith.mulf %18, %20 : vector<8x32xf32>
    %c0_7 = arith.constant 0 : index
    %c0_8 = arith.constant 0 : index
    %22 = vector.load %arg3[%c0_7, %c0_8] : memref<1x32xf32, #tpu.memory_space<vmem>>, vector<1x32xf32>
    %23 = vector.broadcast %22 : vector<1x32xf32> to vector<8x32xf32>
    %24 = arith.addf %21, %23 : vector<8x32xf32>
    %c0_9 = arith.constant 0 : index
    %c0_10 = arith.constant 0 : index
    %25 = vector.load %arg4[%c0_9, %c0_10] : memref<8x32xf32, #tpu.memory_space<vmem>>, vector<8x32xf32>
    tpu.vector_store %arg4[%c0_9, %c0_10], %24 {strides = array<i32>} : memref<8x32xf32, #tpu.memory_space<vmem>>, vector<8x32xf32>,
    return
  }
  func.func @transform_0(%arg0: i32) -> (i32, i32) {
    %c0_i32 = arith.constant 0 : i32
    %c0_i32_0 = arith.constant 0 : i32
    return %arg0, %c0_i32 : i32, i32
  }
  func.func @transform_1(%arg0: i32) -> (i32, i32) {
    %c0_i32 = arith.constant 0 : i32
    %c0_i32_0 = arith.constant 0 : i32
    %c0_i32_1 = arith.constant 0 : i32
    return %c0_i32, %c0_i32_0 : i32, i32
  }
  func.func @transform_2(%arg0: i32) -> (i32, i32) {
    %c0_i32 = arith.constant 0 : i32
    %c0_i32_0 = arith.constant 0 : i32
    %c0_i32_1 = arith.constant 0 : i32
    return %c0_i32, %c0_i32_0 : i32, i32
  }
  func.func @transform_3(%arg0: i32) -> (i32, i32) {
    %c0_i32 = arith.constant 0 : i32
    %c0_i32_0 = arith.constant 0 : i32
    return %arg0, %c0_i32 : i32, i32
  }
}

</mosaic_0001>

<bundles_post_ra>
// kernel: transformer_encoder_forward.12
= control target key start
LH: loop header
LB: loop body
LE: loop exit
PB: predicated region body
PF: predicated region fallthrough
CT: control target
= control target key end

     0   :  { %vm67_vm0 = vcmask 1043456   ;;  %vm68_vm1 = vcmask 1044480   ;;  %v243_v0 = vmov 0.0   ;;  %v244_v3 = vmov 65535   ;;  %s382_s1 = inlined_call_operand.vmem [shape: f32[9,128], index: 1, kind: input, shape index: {}]   ;;  %s383_s0 = inlined_call_operand.vmem [shape: f32[104,9], index: 0, kind: input, shape index: {}]   ;;  %s384_s2 = inlined_call_operand.vmem [shape: f32[1,128], index: 2, kind: input, shape index: {}]   ;;  %s385_s3 = inlined_call_operand.vmem [shape: f32[104,128], index: 3, kind: output, shape index: {}]  }
   0x1   :  { %208 = vmatprep.subr.bf16.mxu0 %v243_v0  ;;  %v35_v1 = vld [vmem:[%s382_s1] sm:$0xff]  ;;  %v36_v2 = vld [vmem:[%s382_s1 + $0x8] sm:$0x1]  ;;  %v69_v4 = vsel %vm67_vm0, 4294967295, %v244_v3  ;;  %238 = vmatprep.subr.bf16.mxu1 %v243_v0  ;;  %vm245_vm2 = vmmov 0   ;;  %vm45_vm3 = vcmask 72704  }
   0x2   :  { %v15_v5 = vld [vmem:[%s383_s0] sm:$0xff]  ;;  %v37_v6 = vpack.c.bf16 %v36_v2, %v35_v1  ;;  %v70_v7 = vsel %vm68_vm1, %v69_v4, 0  ;;  %210 = vmatprep.mubr.msk.bf16.mxu0 %vm245_vm2, %v243_v0  ;;  %v16_v8 = vld [vmem:[%s383_s0 + $0x8] sm:$0xff]  ;;  %226 = vmatprep.mubr.msk.bf16.mxu1 %vm245_vm2, %v243_v0  ;;  %v17_v14 = vld [vmem:[%s383_s0 + $0x10] sm:$0xff] }
   0x3   :  { %v23_v9 = vld [vmem:[%s383_s0 + $0x40] sm:$0xff]  ;;  %v24_v10 = vld [vmem:[%s383_s0 + $0x48] sm:$0xff]  ;;  %v28_v12 = vpack.c.bf16 %v16_v8, %v15_v5  ;;  %v18_v15 = vld [vmem:[%s383_s0 + $0x18] sm:$0xff] }
   0x4   :  { %v72_v11 = vand.u32 %v70_v7, %v37_v6  ;;  %v32_v13 = vpack.c.bf16 %v24_v10, %v23_v9  ;;  %v25_v16 = vld [vmem:[%s383_s0 + $0x50] sm:$0xff]  ;;  %v26_v17 = vld [vmem:[%s383_s0 + $0x58] sm:$0xff]  ;;  %v29_v18 = vpack.c.bf16 %v18_v15, %v17_v14  ;;  %v19_v20 = vld [vmem:[%s383_s0 + $0x20] sm:$0xff] }
   0x5   :  { %v33_v19 = vpack.c.bf16 %v26_v17, %v25_v16  ;;  %v20_v21 = vld [vmem:[%s383_s0 + $0x28] sm:$0xff]  ;;  %v27_v22 = vld [vmem:[%s383_s0 + $0x60] sm:$0xff]  ;;  %v21_v25 = vld [vmem:[%s383_s0 + $0x30] sm:$0xff] }
   0x6   :  { %209 = vmatpush3.bf16.msra.mxu0 %v72_v11  ;;  %239 = vmatpush3.bf16.msra.mxu1 %v72_v11  ;;  %v30_v23 = vpack.c.bf16 %v20_v21, %v19_v20  ;;  %v34_v24 = vpack.c.bf16 %v27_v22, %v27_v22  ;;  %v22_v26 = vld [vmem:[%s383_s0 + $0x38] sm:$0xff]  ;;  %v328_v28 = vld [vmem:[%s384_s2] ss:$0 sm:$0xff] }
   0x7   :  { %v31_v27 = vpack.c.bf16 %v22_v26, %v21_v25 }
   0x9   :  { %211 = vmatmul.mubr.msk.bf16.vlgmr.msra.gmra.mrb[0].mxu0 %vm45_vm3, %v28_v12  ;;  %227 = vmatmul.mubr.msk.bf16.vlgmr.msra.gmra.mrb[0].mxu1 %vm45_vm3, %v32_v13 }
   0xa   :  { %214 = vmatprep.mubr.msk.bf16.mxu0 %vm245_vm2, %v243_v0  ;;  %230 = vmatprep.mubr.msk.bf16.mxu1 %vm245_vm2, %v243_v0 }
  0x11   :  { %215 = vmatmul.mubr.msk.bf16.gmra.mrb[4].mxu0 %vm45_vm3, %v29_v18  ;;  %231 = vmatmul.mubr.msk.bf16.gmra.mrb[4].mxu1 %vm45_vm3, %v33_v19 }
  0x12   :  { %218 = vmatprep.mubr.msk.bf16.mxu0 %vm245_vm2, %v243_v0  ;;  %234 = vmatprep.mubr.msk.bf16.mxu1 %vm245_vm2, %v243_v0 }
  0x19   :  { %219 = vmatmul.mubr.msk.bf16.gmra.mrb[8].mxu0 %vm45_vm3, %v30_v23  ;;  %235 = vmatmul.mubr.msk.bf16.gmra.mrb[8].mxu1 %vm45_vm3, %v34_v24 }
  0x1a   :  { %222 = vmatprep.mubr.msk.bf16.mxu0 %vm245_vm2, %v243_v0 }
  0x21   :  { %223 = vmatmul.mubr.msk.bf16.gmra.mrb[12].mxu0 %vm45_vm3, %v31_v27 }
  0xdc   :  { %v108_v29 = vpop.f32.mrb[0].mxu0  ;;  %v140_v30 = vpop.f32.mrb[0].mxu1 }
  0xdd   :  { %v109_v31 = vadd.f32 %v328_v28, %v108_v29  ;;  %v212_v32 = vpop.f32.mrb[1].mxu0  ;;  %v141_v33 = vadd.f32 %v328_v28, %v140_v30  ;;  %v228_v34 = vpop.f32.mrb[1].mxu1 }
  0xde   :  { %v111_v35 = vpop.f32.mrb[2].mxu0  ;;  %v143_v36 = vpop.f32.mrb[2].mxu1 }
  0xdf   :  { %v162_v37 = vmax.f32 %v109_v31, 0.0  ;;  %v112_v38 = vadd.f32 %v328_v28, %v111_v35  ;;  %v213_v39 = vpop.f32.mrb[3].mxu0  ;;  %v170_v40 = vmax.f32 %v141_v33, 0.0  ;;  %v144_v41 = vadd.f32 %v328_v28, %v143_v36  ;;  %v229_v42 = vpop.f32.mrb[3].mxu1 }
  0xe1   :  { %175 = vst [vmem:[%s385_s3] sm:$0xff] %v162_v37  ;;  %v163_v43 = vmax.f32 %v112_v38, 0.0  ;;  %183 = vst [vmem:[%s385_s3 + $0x40] sm:$0xff] %v170_v40  ;;  %v171_v44 = vmax.f32 %v144_v41, 0.0 }
  0xe3   :  { %176 = vst [vmem:[%s385_s3 + $0x8] sm:$0xff] %v163_v43  ;;  %184 = vst [vmem:[%s385_s3 + $0x48] sm:$0xff] %v171_v44 }
  0xe4   :  { %v116_v45 = vpop.f32.mrb[4].mxu0  ;;  %v148_v46 = vpop.f32.mrb[4].mxu1 }
  0xe5   :  { %v117_v47 = vadd.f32 %v328_v28, %v116_v45  ;;  %v216_v48 = vpop.f32.mrb[5].mxu0  ;;  %v149_v49 = vadd.f32 %v328_v28, %v148_v46  ;;  %v232_v50 = vpop.f32.mrb[5].mxu1 }
  0xe6   :  { %v119_v51 = vpop.f32.mrb[6].mxu0  ;;  %v151_v52 = vpop.f32.mrb[6].mxu1 }
  0xe7   :  { %v164_v53 = vmax.f32 %v117_v47, 0.0  ;;  %v120_v54 = vadd.f32 %v328_v28, %v119_v51  ;;  %v217_v55 = vpop.f32.mrb[7].mxu0  ;;  %v172_v56 = vmax.f32 %v149_v49, 0.0  ;;  %v152_v57 = vadd.f32 %v328_v28, %v151_v52  ;;  %v233_v58 = vpop.f32.mrb[7].mxu1 }
  0xe9   :  { %177 = vst [vmem:[%s385_s3 + $0x10] sm:$0xff] %v164_v53  ;;  %v165_v59 = vmax.f32 %v120_v54, 0.0  ;;  %185 = vst [vmem:[%s385_s3 + $0x50] sm:$0xff] %v172_v56  ;;  %v173_v60 = vmax.f32 %v152_v57, 0.0 }
  0xeb   :  { %178 = vst [vmem:[%s385_s3 + $0x18] sm:$0xff] %v165_v59  ;;  %186 = vst [vmem:[%s385_s3 + $0x58] sm:$0xff] %v173_v60 }
  0xec   :  { %v124_v61 = vpop.f32.mrb[8].mxu0  ;;  %v156_v62 = vpop.f32.mrb[8].mxu1 }
  0xed   :  { %v125_v63 = vadd.f32 %v328_v28, %v124_v61  ;;  %v220_v0 = vpop.f32.mrb[9].mxu0  ;;  %v157_v1 = vadd.f32 %v328_v28, %v156_v62  ;;  %v236_v2 = vpop.f32.mrb[9].mxu1 }
  0xee   :  { %v127_v3 = vpop.f32.mrb[10].mxu0  ;;  %v159_v4 = vpop.f32.mrb[10].mxu1 }
  0xef   :  { %v166_v5 = vmax.f32 %v125_v63, 0.0  ;;  %v128_v6 = vadd.f32 %v328_v28, %v127_v3  ;;  %v221_v7 = vpop.f32.mrb[11].mxu0  ;;  %v174_v8 = vmax.f32 %v157_v1, 0.0  ;;  %v237_v9 = vpop.f32.mrb[11].mxu1 }
  0xf1   :  { %179 = vst [vmem:[%s385_s3 + $0x20] sm:$0xff] %v166_v5  ;;  %v167_v10 = vmax.f32 %v128_v6, 0.0  ;;  %187 = vst [vmem:[%s385_s3 + $0x60] sm:$0xff] %v174_v8 }
  0xf3   :  { %180 = vst [vmem:[%s385_s3 + $0x28] sm:$0xff] %v167_v10 }
  0xf4   :  { %v132_v11 = vpop.f32.mrb[12].mxu0 }
  0xf5   :  { %v133_v12 = vadd.f32 %v328_v28, %v132_v11  ;;  %v224_v13 = vpop.f32.mrb[13].mxu0 }
  0xf6   :  { %v135_v14 = vpop.f32.mrb[14].mxu0 }
  0xf7   :  { %v168_v15 = vmax.f32 %v133_v12, 0.0  ;;  %v136_v16 = vadd.f32 %v328_v28, %v135_v14  ;;  %v225_v17 = vpop.f32.mrb[15].mxu0 }
  0xf9   :  { %181 = vst [vmem:[%s385_s3 + $0x30] sm:$0xff] %v168_v15  ;;  %v169_v18 = vmax.f32 %v136_v16, 0.0 }
  0xfb   :  { %182 = vst [vmem:[%s385_s3 + $0x38] sm:$0xff] %v169_v18 }

// kernel: transformer_encoder_forward.13
= control target key start
LH: loop header
LB: loop body
LE: loop exit
PB: predicated region body
PF: predicated region fallthrough
CT: control target
= control target key end

     0   :  { %vm91_vm0 = vcmask 261120   ;;  %s416_s1 = inlined_call_operand.vmem [shape: f32[288,128], index: 1, kind: input, shape index: {}]   ;;  %s417_s0 = inlined_call_operand.vmem [shape: f32[24,288], index: 0, kind: input, shape index: {}]   ;;  %s418_s2 = inlined_call_operand.vmem [shape: f32[1,128], index: 2, kind: input, shape index: {}]   ;;  %s419_s3 = inlined_call_operand.vmem [shape: f32[24,128], index: 3, kind: output, shape index: {}]  }
   0x1   :  { %v46_v0 = vld [vmem:[%s416_s1 + $0x80] sm:$0xff]  ;;  %v47_v1 = vld [vmem:[%s416_s1 + $0x88] sm:$0xff]  ;;  %v48_v5 = vld [vmem:[%s416_s1 + $0x90] sm:$0xff] }
   0x2   :  { %v30_v2 = vld [vmem:[%s416_s1] sm:$0xff]  ;;  %v74_v3 = vpack.c.bf16 %v47_v1, %v46_v0  ;;  %v31_v4 = vld [vmem:[%s416_s1 + $0x8] sm:$0xff]  ;;  %v49_v6 = vld [vmem:[%s416_s1 + $0x98] sm:$0xff] }
   0x3   :  { %v66_v7 = vpack.c.bf16 %v31_v4, %v30_v2  ;;  %v75_v8 = vpack.c.bf16 %v49_v6, %v48_v5  ;;  %v32_v9 = vld [vmem:[%s416_s1 + $0x10] sm:$0xff]  ;;  %v33_v10 = vld [vmem:[%s416_s1 + $0x18] sm:$0xff]  ;;  %v50_v11 = vld [vmem:[%s416_s1 + $0xa0] sm:$0xff] }
   0x4   :  { %207 = vmatprep.subr.bf16.mxu0 %v74_v3  ;;  %v51_v12 = vld [vmem:[%s416_s1 + $0xa8] sm:$0xff]  ;;  %v67_v13 = vpack.c.bf16 %v33_v10, %v32_v9  ;;  %v34_v15 = vld [vmem:[%s416_s1 + $0x20] sm:$0xff]  ;;  %v52_v17 = vld [vmem:[%s416_s1 + $0xb0] sm:$0xff] }
   0x5   :  { %208 = vmatpush3.bf16.msra.mxu0 %v66_v7  ;;  %v76_v14 = vpack.c.bf16 %v51_v12, %v50_v11  ;;  %v35_v16 = vld [vmem:[%s416_s1 + $0x28] sm:$0xff]  ;;  %v53_v18 = vld [vmem:[%s416_s1 + $0xb8] sm:$0xff]  ;;  %v36_v21 = vld [vmem:[%s416_s1 + $0x30] sm:$0xff] }
   0x6   :  { %209 = vmatprep.subr.bf16.mxu0 %v75_v8  ;;  %v68_v19 = vpack.c.bf16 %v35_v16, %v34_v15  ;;  %v77_v20 = vpack.c.bf16 %v53_v18, %v52_v17  ;;  %v37_v22 = vld [vmem:[%s416_s1 + $0x38] sm:$0xff]  ;;  %v54_v23 = vld [vmem:[%s416_s1 + $0xc0] sm:$0xff]  ;;  %v55_v24 = vld [vmem:[%s416_s1 + $0xc8] sm:$0xff] }
   0x7   :  { %v62_v25 = vld [vmem:[%s416_s1 + $0x100] sm:$0xff]  ;;  %v63_v26 = vld [vmem:[%s416_s1 + $0x108] sm:$0xff]  ;;  %v69_v30 = vpack.c.bf16 %v37_v22, %v36_v21  ;;  %v64_v34 = vld [vmem:[%s416_s1 + $0x110] sm:$0xff]  ;;  %v78_v35 = vpack.c.bf16 %v55_v24, %v54_v23 }
   0x8   :  { %v82_v27 = vpack.c.bf16 %v63_v26, %v62_v25  ;;  %v16_v28 = vld [vmem:[%s417_s0 + $0x8] sm:$0xff]  ;;  %v19_v29 = vld [vmem:[%s417_s0 + $0x20] sm:$0xff]  ;;  %v65_v36 = vld [vmem:[%s416_s1 + $0x118] sm:$0xff] }
   0x9   :  { %210 = vmatpush3.bf16.msra.mxu0 %v67_v13  ;;  %v38_v31 = vld [vmem:[%s416_s1 + $0x40] sm:$0xff]  ;;  %v39_v32 = vld [vmem:[%s416_s1 + $0x48] sm:$0xff]  ;;  %v25_v33 = vpack.c.bf16 %v19_v29, %v16_v28  ;;  %v17_v37 = vld [vmem:[%s417_s0 + $0x10] sm:$0xff]  ;;  %v83_v41 = vpack.c.bf16 %v65_v36, %v64_v34 }
   0xa   :  { %211 = vmatprep.subr.bf16.mxu0 %v76_v14  ;;  %239 = vmatprep.subr.bf16.mxu1 %v82_v27  ;;  %v20_v38 = vld [vmem:[%s417_s0 + $0x28] sm:$0xff]  ;;  %v56_v39 = vld [vmem:[%s416_s1 + $0xd0] sm:$0xff]  ;;  %v57_v40 = vld [vmem:[%s416_s1 + $0xd8] sm:$0xff]  ;;  %v70_v44 = vpack.c.bf16 %v39_v32, %v38_v31 }
   0xb   :  { %240 = vmatpush3.bf16.msra.mxu1 %v82_v27  ;;  %130 = vmatprep.mubr.bf16.mxu0 %v25_v33  ;;  %v26_v42 = vpack.c.bf16 %v20_v38, %v17_v37  ;;  %v23_v43 = vld [vmem:[%s417_s0 + $0x40] sm:$0xff]  ;;  %v79_v45 = vpack.c.bf16 %v57_v40, %v56_v39  ;;  %v40_v46 = vld [vmem:[%s416_s1 + $0x50] sm:$0xff]  ;;  %v41_v47 = vld [vmem:[%s416_s1 + $0x58] sm:$0xff] }
   0xc   :  { %241 = vmatprep.subr.bf16.mxu1 %v83_v41  ;;  %v29_v48 = vpack.c.bf16 %v23_v43, %v23_v43  ;;  %v58_v49 = vld [vmem:[%s416_s1 + $0xe0] sm:$0xff]  ;;  %v59_v50 = vld [vmem:[%s416_s1 + $0xe8] sm:$0xff]  ;;  %v71_v51 = vpack.c.bf16 %v41_v47, %v40_v46  ;;  %v60_v55 = vld [vmem:[%s416_s1 + $0xf0] sm:$0xff] }
   0xd   :  { %212 = vmatpush3.bf16.msra.mxu0 %v68_v19  ;;  %243 = vmatprep.mubr.msk.bf16.mxu1 %vm91_vm0, %v26_v42  ;;  %v80_v52 = vpack.c.bf16 %v59_v50, %v58_v49  ;;  %v42_v53 = vld [vmem:[%s416_s1 + $0x60] sm:$0xff]  ;;  %v43_v54 = vld [vmem:[%s416_s1 + $0x68] sm:$0xff]  ;;  %v61_v56 = vld [vmem:[%s416_s1 + $0xf8] sm:$0xff] }
   0xe   :  { %213 = vmatprep.subr.bf16.mxu0 %v77_v20  ;;  %v72_v57 = vpack.c.bf16 %v43_v54, %v42_v53  ;;  %v81_v58 = vpack.c.bf16 %v61_v56, %v60_v55  ;;  %v44_v59 = vld [vmem:[%s416_s1 + $0x70] sm:$0xff]  ;;  %v45_v60 = vld [vmem:[%s416_s1 + $0x78] sm:$0xff]  ;;  %v15_v62 = vld [vmem:[%s417_s0] sm:$0xff] }
   0xf   :  { %242 = vmatpush3.bf16.msra.mxu1 %v83_v41  ;;  %v73_v61 = vpack.c.bf16 %v45_v60, %v44_v59  ;;  %v18_v63 = vld [vmem:[%s417_s0 + $0x18] sm:$0xff]  ;;  %v21_v3 = vld [vmem:[%s417_s0 + $0x30] sm:$0xff]  ;;  %v204_v11 = vld [vmem:[%s418_s2] ss:$0 sm:$0xff] }
  0x10   :  { %v22_v0 = vld [vmem:[%s417_s0 + $0x38] sm:$0xff]  ;;  %v24_v1 = vpack.c.bf16 %v18_v63, %v15_v62  ;;  %v27_v4 = vpack.c.bf16 %v21_v3, %v21_v3 }
  0x11   :  { %214 = vmatpush3.bf16.msra.mxu0 %v69_v30  ;;  %v28_v2 = vpack.c.bf16 %v22_v0, %v22_v0 }
  0x12   :  { %215 = vmatprep.subr.bf16.mxu0 %v78_v35  ;;  %244 = vmatmul.mubr.msk.bf16.vlgmr.msra.gmra.mrb[0].mxu1 %vm91_vm0, %v29_v48 }
  0x15   :  { %216 = vmatpush3.bf16.msra.mxu0 %v70_v44 }
  0x16   :  { %217 = vmatprep.subr.bf16.mxu0 %v79_v45 }
  0x19   :  { %218 = vmatpush3.bf16.msra.mxu0 %v71_v51 }
  0x1a   :  { %219 = vmatprep.subr.bf16.mxu0 %v80_v52 }
  0x1d   :  { %220 = vmatpush3.bf16.msra.mxu0 %v72_v57 }
  0x1e   :  { %221 = vmatprep.subr.bf16.mxu0 %v81_v58 }
  0x21   :  { %222 = vmatpush3.bf16.msra.mxu0 %v73_v61 }
  0x24   :  { %131 = vmatmul.mubr.bf16.vlgmr.msra.gmra.mrb[0].mxu0 %v24_v1 }
  0x25   :  { %138 = vmatprep.mubr.bf16.mxu0 %v28_v2 }
  0x2c   :  { %139 = vmatmul.mubr.bf16.gmra.mrb[4].mxu0 %v27_v4 }
  0xe5   :  { %v245_v5 = vpop.f32.mrb[0].mxu1 }
  0xe6   :  { %v180_v6 = vpop.f32.mrb[1].mxu1 }
  0xe7   :  { %v246_v7 = vpop.f32.mrb[2].mxu1 }
  0xe8   :  { %v183_v8 = vpop.f32.mrb[3].mxu1 }
  0xf7   :  { %v223_v9 = vpop.f32.mrb[0].mxu0 }
  0xf8   :  { %v224_v10 = vpop.f32.mrb[1].mxu0 }
  0xf9   :  { %v225_v12 = vadd.f32 %v224_v10, %v223_v9  ;;  %v226_v13 = vpop.f32.mrb[2].mxu0 }
  0xfa   :  { %v227_v14 = vpop.f32.mrb[3].mxu0 }
  0xfb   :  { %v228_v15 = vadd.f32 %v227_v14, %v226_v13  ;;  %v133_v16 = vadd.f32 %v225_v12, %v204_v11 }
  0xfd   :  { %v181_v17 = vadd.f32 %v180_v6, %v133_v16  ;;  %v136_v18 = vadd.f32 %v228_v15, %v204_v11 }
  0xff   :  { %v194_v19 = vmax.f32 %v181_v17, 0.0  ;;  %v184_v20 = vadd.f32 %v183_v8, %v136_v18  ;;  %v229_v21 = vpop.f32.mrb[4].mxu0 }
 0x100   :  { %v230_v22 = vpop.f32.mrb[5].mxu0 }
 0x101   :  { %197 = vst [vmem:[%s419_s3] sm:$0xff] %v194_v19  ;;  %v195_v23 = vmax.f32 %v184_v20, 0.0  ;;  %v231_v24 = vadd.f32 %v230_v22, %v229_v21  ;;  %v232_v25 = vpop.f32.mrb[6].mxu0 }
 0x102   :  { %v233_v26 = vpop.f32.mrb[7].mxu0 }
 0x103   :  { %198 = vst [vmem:[%s419_s3 + $0x8] sm:$0xff] %v195_v23  ;;  %v141_v27 = vadd.f32 %v231_v24, %v204_v11 }
 0x105   :  { %v189_v28 = vadd.f32 %v245_v5, %v141_v27 }
 0x107   :  { %v196_v29 = vmax.f32 %v189_v28, 0.0 }
 0x109   :  { %199 = vst [vmem:[%s419_s3 + $0x10] sm:$0xff] %v196_v29 }

// kernel: transformer_encoder_forward.14
= control target key start
LH: loop header
LB: loop body
LE: loop exit
PB: predicated region body
PF: predicated region fallthrough
CT: control target
= control target key end

     0   :  { %v118_v0 = vmov 0.0   ;;  %vm119_vm0 = vmmov 0   ;;  %vm42_vm1 = vcmask 785408   ;;  %s185_s1 = inlined_call_operand.vmem [shape: f32[96,128], index: 1, kind: input, shape index: {}]   ;;  %s186_s0 = inlined_call_operand.vmem [shape: f32[8,96], index: 0, kind: input, shape index: {}]   ;;  %s187_s2 = inlined_call_operand.vmem [shape: f32[1,128], index: 2, kind: input, shape index: {}]   ;;  %s188_s3 = inlined_call_operand.vmem [shape: f32[8,128], index: 3, kind: output, shape index: {}]  }
   0x1   :  { %100 = vmatprep.subr.bf16.mxu0 %v118_v0  ;;  %v17_v1 = vld [vmem:[%s185_s1] sm:$0xff]  ;;  %v18_v2 = vld [vmem:[%s185_s1 + $0x8] sm:$0xff]  ;;  %v19_v3 = vld [vmem:[%s185_s1 + $0x10] sm:$0xff]  ;;  %112 = vmatprep.mubr.msk.bf16.mxu0 %vm119_vm0, %v118_v0 }
   0x2   :  { %v29_v4 = vpack.c.bf16 %v18_v2, %v17_v1  ;;  %v20_v5 = vld [vmem:[%s185_s1 + $0x18] sm:$0xff]  ;;  %v21_v7 = vld [vmem:[%s185_s1 + $0x20] sm:$0xff]  ;;  %v22_v8 = vld [vmem:[%s185_s1 + $0x28] sm:$0xff] }
   0x3   :  { %v30_v6 = vpack.c.bf16 %v20_v5, %v19_v3  ;;  %v31_v9 = vpack.c.bf16 %v22_v8, %v21_v7  ;;  %v23_v10 = vld [vmem:[%s185_s1 + $0x30] sm:$0xff]  ;;  %v24_v11 = vld [vmem:[%s185_s1 + $0x38] sm:$0xff]  ;;  %v25_v13 = vld [vmem:[%s185_s1 + $0x40] sm:$0xff] }
   0x4   :  { %101 = vmatpush3.bf16.msra.mxu0 %v29_v4  ;;  %v32_v12 = vpack.c.bf16 %v24_v11, %v23_v10  ;;  %v26_v14 = vld [vmem:[%s185_s1 + $0x48] sm:$0xff]  ;;  %v27_v16 = vld [vmem:[%s185_s1 + $0x50] sm:$0xff]  ;;  %v28_v17 = vld [vmem:[%s185_s1 + $0x58] sm:$0xff] }
   0x5   :  { %102 = vmatprep.subr.bf16.mxu0 %v118_v0  ;;  %v33_v15 = vpack.c.bf16 %v26_v14, %v25_v13  ;;  %v34_v18 = vpack.c.bf16 %v28_v17, %v27_v16  ;;  %v15_v19 = vld [vmem:[%s186_s0] sm:$0xff] }
   0x6   :  { %v16_v20 = vpack.c.bf16 %v15_v19, %v15_v19  ;;  %v91_v21 = vld [vmem:[%s187_s2] ss:$0 sm:$0xff] }
   0x8   :  { %103 = vmatpush3.bf16.msra.mxu0 %v30_v6 }
   0x9   :  { %104 = vmatprep.subr.bf16.mxu0 %v118_v0 }
   0xc   :  { %105 = vmatpush3.bf16.msra.mxu0 %v31_v9 }
   0xd   :  { %106 = vmatprep.subr.bf16.mxu0 %v118_v0 }
  0x10   :  { %107 = vmatpush3.bf16.msra.mxu0 %v32_v12 }
  0x11   :  { %108 = vmatprep.subr.bf16.mxu0 %v118_v0 }
  0x14   :  { %109 = vmatpush3.bf16.msra.mxu0 %v33_v15 }
  0x15   :  { %110 = vmatprep.subr.bf16.mxu0 %v118_v0 }
  0x18   :  { %111 = vmatpush3.bf16.msra.mxu0 %v34_v18 }
  0x1b   :  { %113 = vmatmul.mubr.msk.bf16.vlgmr.msra.gmra.mrb[0].mxu0 %vm42_vm1, %v16_v20 }
  0xee   :  { %v80_v22 = vpop.f32.mrb[0].mxu0 }
  0xef   :  { %v81_v23 = vadd.f32 %v91_v21, %v80_v22  ;;  %v114_v24 = vpop.f32.mrb[1].mxu0 }
  0xf0   :  { %v83_v25 = vpop.f32.mrb[2].mxu0 }
  0xf1   :  { %86 = vst [vmem:[%s188_s3] sm:$0xff] %v81_v23  ;;  %v115_v26 = vpop.f32.mrb[3].mxu0 }

// kernel: transformer_encoder_forward.17
= control target key start
LH: loop header
LB: loop body
LE: loop exit
PB: predicated region body
PF: predicated region fallthrough
CT: control target
= control target key end

     0   :  { %v94_v0 = vmov 0.0   ;;  %vm95_vm0 = vmmov 0   ;;  %vm30_vm1 = vcmask 261120   ;;  %s137_s1 = inlined_call_operand.vmem [shape: f32[32,128], index: 1, kind: input, shape index: {}]   ;;  %s138_s0 = inlined_call_operand.vmem [shape: f32[8,32], index: 0, kind: input, shape index: {}]   ;;  %s139_s2 = inlined_call_operand.vmem [shape: f32[1,128], index: 2, kind: input, shape index: {}]   ;;  %s140_s3 = inlined_call_operand.vmem [shape: f32[8,128], index: 3, kind: output, shape index: {}]  }
   0x1   :  { %84 = vmatprep.subr.bf16.mxu0 %v94_v0  ;;  %v17_v1 = vld [vmem:[%s137_s1] sm:$0xff]  ;;  %v18_v2 = vld [vmem:[%s137_s1 + $0x8] sm:$0xff]  ;;  %v19_v3 = vld [vmem:[%s137_s1 + $0x10] sm:$0xff]  ;;  %88 = vmatprep.mubr.msk.bf16.mxu0 %vm95_vm0, %v94_v0 }
   0x2   :  { %v21_v4 = vpack.c.bf16 %v18_v2, %v17_v1  ;;  %v20_v5 = vld [vmem:[%s137_s1 + $0x18] sm:$0xff]  ;;  %v15_v7 = vld [vmem:[%s138_s0] sm:$0xff] }
   0x3   :  { %v22_v6 = vpack.c.bf16 %v20_v5, %v19_v3  ;;  %v16_v8 = vpack.c.bf16 %v15_v7, %v15_v7  ;;  %v79_v9 = vld [vmem:[%s139_s2] ss:$0 sm:$0xff] }
   0x4   :  { %85 = vmatpush3.bf16.msra.mxu0 %v21_v4 }
   0x5   :  { %86 = vmatprep.subr.bf16.mxu0 %v94_v0 }
   0x8   :  { %87 = vmatpush3.bf16.msra.mxu0 %v22_v6 }
   0xb   :  { %89 = vmatmul.mubr.msk.bf16.vlgmr.msra.gmra.mrb[0].mxu0 %vm30_vm1, %v16_v8 }
  0xde   :  { %v68_v10 = vpop.f32.mrb[0].mxu0 }
  0xdf   :  { %v69_v11 = vadd.f32 %v79_v9, %v68_v10  ;;  %v90_v12 = vpop.f32.mrb[1].mxu0 }
  0xe0   :  { %v71_v13 = vpop.f32.mrb[2].mxu0 }
  0xe1   :  { %74 = vst [vmem:[%s140_s3] sm:$0xff] %v69_v11  ;;  %v91_v14 = vpop.f32.mrb[3].mxu0 }

// kernel: transformer_encoder_forward.15
= control target key start
LH: loop header
LB: loop body
LE: loop exit
PB: predicated region body
PF: predicated region fallthrough
CT: control target
= control target key end

     0   :  { %vm22_vm0 = vcmask 261120   ;;  %v134_v10 = vmov 0.0   ;;  %vm135_vm1 = vmmov 0   ;;  %s196_s0 = inlined_call_operand.vmem [shape: f32[8,32], index: 0, kind: input, shape index: {}]   ;;  %s197_s3 = inlined_call_operand.vmem [shape: f32[32,128], index: 3, kind: input, shape index: {}]   ;;  %s198_s1 = inlined_call_operand.vmem [shape: f32[1,32], index: 1, kind: input, shape index: {}]   ;;  %s199_s2 = inlined_call_operand.vmem [shape: f32[1,32], index: 2, kind: input, shape index: {}]   ;;  %s200_s4 = inlined_call_operand.vmem [shape: f32[1,128], index: 4, kind: input, shape index: {}]   ;;  %s201_s5 = inlined_call_operand.vmem [shape: f32[8,128], index: 5, kind: output, shape index: {}]  }
   0x1   :  { %v21_v0 = vld [vmem:[%s196_s0] sm:$0xff]  ;;  %v54_v8 = vld [vmem:[%s197_s3 + $0x8] sm:$0xff]  ;;  %122 = vmatprep.subr.bf16.mxu0 %v134_v10  ;;  %v55_v11 = vld [vmem:[%s197_s3 + $0x10] sm:$0xff]  ;;  %126 = vmatprep.mubr.msk.bf16.mxu0 %vm135_vm1, %v134_v10 }
   0x2   :  { %v23_v1 = vsel %vm22_vm0, %v21_v0, 0.0  ;;  %v53_v7 = vld [vmem:[%s197_s3] sm:$0xff]  ;;  %v56_v12 = vld [vmem:[%s197_s3 + $0x18] sm:$0xff] }
   0x3   :  { %24 = vadd.xlane.f32.xlu0 %v23_v1  ;;  %v57_v9 = vpack.c.bf16 %v54_v8, %v53_v7  ;;  %v58_v13 = vpack.c.bf16 %v56_v12, %v55_v11  ;;  %v115_v18 = vld [vmem:[%s198_s1] ss:$0 sm:$0xff] }
   0x4   :  { %v116_v20 = vld [vmem:[%s199_s2] ss:$0 sm:$0xff] }
   0x5   :  { %123 = vmatpush3.bf16.msra.mxu0 %v57_v9  ;;  %v117_v24 = vld [vmem:[%s200_s4] ss:$0 sm:$0xff] }
   0x6   :  { %124 = vmatprep.subr.bf16.mxu0 %v134_v10 }
   0x9   :  { %125 = vmatpush3.bf16.msra.mxu0 %v58_v13 }
  0x90   :  { %v25_v2 = vpop.xlane.xlu0 %24 }
  0x91   :  { %v27_v3 = vmul.f32 0.03125, %v25_v2 }
  0x93   :  { %v28_v4 = vsub.f32 %v21_v0, %v27_v3 }
  0x95   :  { %v29_v5 = vmul.f32 %v28_v4, %v28_v4 }
  0x97   :  { %v30_v6 = vsel %vm22_vm0, %v29_v5, 0.0 }
  0x98   :  { %31 = vadd.xlane.f32.xlu0 %v30_v6 }
 0x125   :  { %v32_v14 = vpop.xlane.xlu0 %31 }
 0x126   :  { %v33_v15 = vmul.f32 0.03125, %v32_v14 }
 0x128   :  { %v34_v16 = vadd.f32 1e-12, %v33_v15 }
 0x12a   :  { %132 = vrsqrt.f32 %v34_v16 }
 0x134   :  { %v133_v17 = vpop.eup %132 }
 0x135   :  { %v36_v19 = vmul.f32 %v133_v17, %v28_v4 }
 0x137   :  { %v44_v21 = vmul.f32 %v115_v18, %v36_v19 }
 0x139   :  { %v52_v22 = vadd.f32 %v116_v20, %v44_v21 }
 0x13b   :  { %v59_v23 = vpack.c.bf16 %v52_v22, %v52_v22 }
 0x13d   :  { %127 = vmatmul.mubr.msk.bf16.vlgmr.msra.gmra.mrb[0].mxu0 %vm22_vm0, %v59_v23 }
 0x210   :  { %v104_v25 = vpop.f32.mrb[0].mxu0 }
 0x211   :  { %v105_v26 = vadd.f32 %v117_v24, %v104_v25  ;;  %v128_v27 = vpop.f32.mrb[1].mxu0 }
 0x212   :  { %v107_v28 = vpop.f32.mrb[2].mxu0 }
 0x213   :  { %110 = vst [vmem:[%s201_s5] sm:$0xff] %v105_v26  ;;  %v129_v29 = vpop.f32.mrb[3].mxu0 }

// kernel: transformer_encoder_forward.16
= control target key start
LH: loop header
LB: loop body
LE: loop exit
PB: predicated region body
PF: predicated region fallthrough
CT: control target
= control target key end

     0   :  { %s867_s9 = smov 0   ;;  %s982_s0 = inlined_call_operand.vmem [shape: f32[2,3,96], index: 0, kind: input, shape index: {}]   ;;  %s983_s1 = inlined_call_operand.vmem [shape: f32[2,1,3], index: 1, kind: input, shape index: {}]   ;;  %s984_s2 = inlined_call_operand.vmem [shape: f32[2,3,32], index: 2, kind: output, shape index: {}]  }
   0x1 LB: > { %s703_s10 = sadd.s32 4294967295, %s832_s9   ;;  %p707_p0 = scmp.ge.s32.totalorder %s832_s9, 1  ;;  %s832_s9 = sphi %s867_s9, %s12_s9  }
   0x2   : > { %p119_p1 = scmp.lt.s32.totalorder %s832_s9, 3 }
   0x4   : > { %p120_p2 = pnand %p707_p0, %p119_p1 }
   0x5   : > { %p142_p3 = scmp.lt.s32.totalorder (!%p120_p2), %s703_s10, 1  ;;  %v834_v0 = vmov (!%p120_p2), 0.0   ;;  %vm835_vm0 = vmmov (!%p120_p2), 0   ;;  %s836_s15 = smov (!%p120_p2), 96   ;;  %vm160_vm1 = vcmask (!%p120_p2), 64512   ;;  %v210_v5 = vlaneseq (!%p120_p2) }
   0x6   : > { %123 = sbr.rel (%p120_p2) target bundleno = 1604 (0x644), region = 28  ;;  %736 = vmatprep.subr.bf16.mxu0 (!%p120_p2), %v834_v0  ;;  %738 = vmatprep.mubr.msk.bf16.mxu0 (!%p120_p2), %vm835_vm0, %v834_v0  ;;  %s837_s16 = smov (!%p120_p2), 64   ;;  %v839_v9 = vmov (!%p120_p2), 0   ;;  %vm216_vm4 = vcmask (!%p120_p2), 18432   ;;  %vm236_vm5 = vcmask (!%p120_p2), 1040384   ;;  %vm237_vm6 = vcmask (!%p120_p2), 1041408  }
   0x7   : > { %742 = vmatprep.subr.bf16.mxu1 (!%p120_p2), %v834_v0  ;;  %744 = vmatprep.mubr.msk.bf16.mxu1 (!%p120_p2), %vm835_vm0, %v834_v0  ;;  %s838_s17 = smov (!%p120_p2), 88   ;;  %v211_v7 = vshrl.u32 (!%p120_p2), %v210_v5, 7  ;;  %s840_s21 = smov (!%p120_p2), 72   ;;  %v841_v20 = vmov (!%p120_p2), 65535   ;;  %vm232_vm7 = vcmask (!%p120_p2), 23552   ;;  %vm635_vm8 = vcmask (!%p120_p2), 130048  }
   0x8   : > { %v238_v21 = vsel (!%p120_p2), %vm236_vm5, 4294967295, %v841_v20  ;;  %s842_s22 = smov (!%p120_p2), 120   ;;  %s843_s23 = smov (!%p120_p2), 80   ;;  %vm637_vm9 = vcmask (!%p120_p2), 195584   ;;  %vm639_vm10 = vcmask (!%p120_p2), 256000  }
   0x9   : > { %v212_v8 = vsub.s32 (!%p120_p2), 0, %v211_v7  ;;  %v911_v22 = vsel (!%p120_p2), %vm237_vm6, %v238_v21, 0  ;;  %s844_s24 = smov (!%p120_p2), 112   ;;  %s845_s25 = smov (!%p120_p2), 104  }
   0xa   : > { %s846_s26 = smov (!%p120_p2), 56   ;;  %s847_s27 = smov (!%p120_p2), 48  }
   0xb   : > { %s848_s28 = smov (!%p120_p2), 40   ;;  %s849_s29 = smov (!%p120_p2), 8  }
   0xc   : > { %s850_s30 = smov (!%p120_p2), 16   ;;  %s851_s3 = smov (!%p120_p2), 24  }
   0xd   : > { %s986_s10 = smov (!%p142_p3, %s703_s10), 1 }
   0xe   : > { %s708_s11 = sshll.u32 %s986_s10, 2  ;;  %s148_s20 = scalar_lea.vmem %s983_s1, %s986_s10 }
   0xf   : > { %s145_s14 = scalar_lea.vmem %s982_s0, %s708_s11  ;;  %v155_v6 = vld [vmem:[%s148_s20] sm:$0x1]  ;;  %s152_s6 = scalar_lea.vmem %s984_s2, %s708_s11 }
  0x10   : > { %v154_v1 = vld [vmem:[%s145_s14] sm:$0x7]  ;;  %vm208_vm2 = vcmp.gt.f32.partialorder %v155_v6, 0.0 }
  0x11   : > { %v889_v2 = vpack.c.bf16 %v154_v1, %v154_v1  ;;  %v209_v10 = vsel %vm208_vm2, 1, %v839_v9 }
  0x12   : > { %v904_v11 = vrot.slane %v209_v10, %v212_v8 }
  0x13   : > { %158 = vrot.lane.b32.xlu0 %v889_v2, %s836_s15  ;;  %230 = vrot.lane.b32.xlu1 %v889_v2, %s837_s16 }
  0x14   : > { %vm214_vm3 = vcmp.eq.s32.totalorder %v904_v11, 1 }
  0x17   : > { %285 = vrot.lane.b32.xlu1 %v889_v2, %s838_s17 }
  0x85   : > { %v159_v3 = vpop.permute.xlu0 %158  ;;  %v231_v19 = vpop.permute.xlu1 %230 }
  0x86   : > { %v165_v4 = vsel %vm160_vm1, %v159_v3, 0  ;;  %v241_v23 = vand.u32 %v911_v22, %v231_v19 }
  0x87   : > { %737 = vmatpush3.bf16.xpose.msra.mxu0 %v165_v4 }
  0x88   : > { %754 = vmatprep.subr.bf16.mxu0 %v834_v0  ;;  %743 = vmatpush3.bf16.msra.mxu1 %v241_v23 }
  0x89   : > { %748 = vmatprep.subr.bf16.mxu1 %v834_v0  ;;  %v286_v29 = vpop.permute.xlu1 %285 }
  0x8a   : > { %v291_v36 = vsel %vm160_vm1, %v286_v29, 0 }
  0x8e   : > { %739 = vmatmul.mubr.msk.bf16.vlgmr.msra.gmra.mrb[0].mxu0 %vm160_vm1, %v889_v2 }
  0x8f   : > { %756 = vmatprep.mubr.msk.bf16.mxu0 %vm835_vm0, %v834_v0 }
 0x161   : > { %v201_v12 = vpop.f32.mrb[0].mxu0 }
 0x162   : > { %v207_v13 = vmul.f32 0.35355338, %v201_v12  ;;  %v740_v14 = vpop.f32.mrb[1].mxu0 }
 0x163   : > { %v204_v15 = vpop.f32.mrb[2].mxu0 }
 0x164   : > { %v741_v16 = vpop.f32.mrb[3].mxu0  ;;  %v215_v17 = vsel %vm214_vm3, %v207_v13, -3.4028235e+38 }
 0x165   : > { %v217_v18 = vsel %vm216_vm4, %v215_v17, -inf }
 0x166   : > { %218 = vmax.xlane.f32.xlu0 %v217_v18 }
 0x17c   : > { %511 = vrot.lane.b32.xlu0 %v889_v2, %s840_s21 }
 0x1f3   : > { %v219_v24 = vpop.xlane.xlu0 %218 }
 0x1f4   : > { %v220_v25 = vsub.f32 %v215_v17, %v219_v24 }
 0x1f6   : > { %v221_v26 = vmul.f32 1.442695, %v220_v25 }
 0x1f7   : > { %v512_v39 = vpop.permute.xlu0 %511 }
 0x1f8   : > { %810 = vpow2.f32 %v221_v26  ;;  %v517_v41 = vsel %vm160_vm1, %v512_v39, 0 }
 0x202   : > { %v811_v27 = vpop.eup %810 }
 0x203   : > { %v223_v28 = vsel %vm216_vm4, %v811_v27, 0.0 }
 0x204   : > { %224 = vadd.xlane.f32.xlu1 %v223_v28 }
 0x215   : > { %283 = vrot.lane.b32.xlu1 %v889_v2, %s842_s22 }
 0x219   : > { %398 = vrot.lane.b32.xlu1 %v889_v2, %s843_s23 }
 0x21d   : > { %396 = vrot.lane.b32.xlu1 %v889_v2, %s844_s24 }
 0x221   : > { %509 = vrot.lane.b32.xlu1 %v889_v2, %s845_s25 }
 0x291   : > { %v225_v30 = vpop.xlane.xlu1 %224 }
 0x292   : > { %812 = vrcp.f32 %v225_v30 }
 0x295   : > { %v284_v34 = vpop.permute.xlu1 %283 }
 0x299   : > { %v399_v37 = vpop.permute.xlu1 %398 }
 0x29a   : > { %v404_v38 = vsel %vm160_vm1, %v399_v37, 0 }
 0x29c   : > { %v813_v31 = vpop.eup %812 }
 0x29d   : > { %v227_v32 = vmul.f32 %v813_v31, %v811_v27  ;;  %v397_v40 = vpop.permute.xlu1 %396 }
 0x29f   : > { %v228_v33 = vsel %vm214_vm3, %v227_v32, 0.0 }
 0x2a0   : > { %v229_v35 = vpack.c.bf16 %v228_v33, %v228_v33 }
 0x2a1   : > { %v510_v42 = vpop.permute.xlu1 %509 }
 0x2a2   : > { %745 = vmatmul.mubr.msk.bf16.vlgmr.msra.gmra.mrb[0].mxu1 %vm232_vm7, %v229_v35 }
 0x2a3   : > { %749 = vmatpush3.bf16.xpose.msra.mxu1 %v291_v36  ;;  %750 = vmatprep.mubr.msk.bf16.mxu1 %vm835_vm0, %v834_v0 }
 0x2a4   : > { %760 = vmatprep.subr.bf16.mxu1 %v834_v0 }
 0x2aa   : > { %751 = vmatmul.mubr.msk.bf16.vlgmr.msra.gmra.mrb[4].mxu1 %vm160_vm1, %v284_v34 }
 0x2ab   : > { %761 = vmatpush3.bf16.xpose.msra.mxu1 %v404_v38  ;;  %762 = vmatprep.mubr.msk.bf16.mxu1 %vm835_vm0, %v834_v0 }
 0x2ac   : > { %772 = vmatprep.subr.bf16.mxu1 %v834_v0 }
 0x2b2   : > { %763 = vmatmul.mubr.msk.bf16.vlgmr.msra.gmra.mrb[8].mxu1 %vm160_vm1, %v397_v40 }
 0x2b3   : > { %773 = vmatpush3.bf16.xpose.msra.mxu1 %v517_v41  ;;  %774 = vmatprep.mubr.msk.bf16.mxu1 %vm835_vm0, %v834_v0 }
 0x2ba   : > { %775 = vmatmul.mubr.msk.bf16.vlgmr.msra.gmra.mrb[12].mxu1 %vm160_vm1, %v510_v42 }
 0x375   : > { %v937_v43 = vpop.f32.mrb[0].mxu1 }
 0x376   : > { %v746_v44 = vpop.f32.mrb[1].mxu1 }
 0x377   : > { %v280_v45 = vpop.f32.mrb[2].mxu1 }
 0x378   : > { %v747_v46 = vpop.f32.mrb[3].mxu1 }
 0x37d   : > { %v327_v47 = vpop.f32.mrb[4].mxu1 }
 0x37e   : > { %v333_v48 = vmul.f32 0.35355338, %v327_v47  ;;  %v752_v49 = vpop.f32.mrb[5].mxu1 }
 0x37f   : > { %v330_v50 = vpop.f32.mrb[6].mxu1 }
 0x380   : > { %v753_v51 = vpop.f32.mrb[7].mxu1  ;;  %v334_v52 = vsel %vm214_vm3, %v333_v48, -3.4028235e+38 }
 0x381   : > { %v335_v53 = vsel %vm216_vm4, %v334_v52, -inf }
 0x382   : > { %336 = vmax.xlane.f32.xlu1 %v335_v53 }
 0x385   : > { %v440_v54 = vpop.f32.mrb[8].mxu1 }
 0x386   : > { %v446_v55 = vmul.f32 0.35355338, %v440_v54  ;;  %v764_v56 = vpop.f32.mrb[9].mxu1 }
 0x387   : > { %v443_v57 = vpop.f32.mrb[10].mxu1 }
 0x388   : > { %v447_v58 = vsel %vm214_vm3, %v446_v55, -3.4028235e+38  ;;  %v765_v59 = vpop.f32.mrb[11].mxu1 }
 0x389   : > { %v448_v60 = vsel %vm216_vm4, %v447_v58, -inf }
 0x38a   : > { %449 = vmax.xlane.f32.xlu0 %v448_v60 }
 0x38d   : > { %v553_v61 = vpop.f32.mrb[12].mxu1 }
 0x38e   : > { %v559_v62 = vmul.f32 0.35355338, %v553_v61  ;;  %v776_v63 = vpop.f32.mrb[13].mxu1 }
 0x38f   : > { %v556_v1 = vpop.f32.mrb[14].mxu1 }
 0x390   : > { %v560_v3 = vsel %vm214_vm3, %v559_v62, -3.4028235e+38  ;;  %v777_v4 = vpop.f32.mrb[15].mxu1 }
 0x391   : > { %v561_v5 = vsel %vm216_vm4, %v560_v3, -inf }
 0x392   : > { %562 = vmax.xlane.f32.xlu1 %v561_v5 }
 0x40f   : > { %v337_v6 = vpop.xlane.xlu1 %336 }
 0x410   : > { %v338_v7 = vsub.f32 %v334_v52, %v337_v6 }
 0x412   : > { %v339_v8 = vmul.f32 1.442695, %v338_v7 }
 0x414   : > { %814 = vpow2.f32 %v339_v8 }
 0x417   : > { %v450_v17 = vpop.xlane.xlu0 %449 }
 0x418   : > { %v451_v18 = vsub.f32 %v447_v58, %v450_v17 }
 0x41a   : > { %v452_v19 = vmul.f32 1.442695, %v451_v18 }
 0x41e   : > { %v815_v9 = vpop.eup %814 }
 0x41f   : > { %v563_v10 = vpop.xlane.xlu1 %562  ;;  %v341_v12 = vsel %vm216_vm4, %v815_v9, 0.0 }
 0x420   : > { %v564_v13 = vsub.f32 %v560_v3, %v563_v10  ;;  %342 = vadd.xlane.f32.xlu1 %v341_v12 }
 0x422   : > { %v565_v14 = vmul.f32 1.442695, %v564_v13 }
 0x424   : > { %816 = vpow2.f32 %v565_v14 }
 0x425   : > { %818 = vpow2.f32 %v452_v19 }
 0x42e   : > { %v817_v15 = vpop.eup %816 }
 0x42f   : > { %v567_v16 = vsel %vm216_vm4, %v817_v15, 0.0  ;;  %v819_v20 = vpop.eup %818 }
 0x430   : > { %568 = vadd.xlane.f32.xlu0 %v567_v16  ;;  %v454_v21 = vsel %vm216_vm4, %v819_v20, 0.0 }
 0x431   : > { %348 = vrot.lane.b32.xlu1 %v889_v2, %s846_s26 }
 0x446   : > { %461 = vrot.lane.b32.xlu0 %v889_v2, %s847_s27 }
 0x455   : > { %455 = vadd.xlane.f32.xlu1 %v454_v21 }
 0x466   : > { %574 = vrot.lane.b32.xlu1 %v889_v2, %s848_s28 }
 0x4ad   : > { %v343_v23 = vpop.xlane.xlu1 %342 }
 0x4ae   : > { %820 = vrcp.f32 %v343_v23 }
 0x4b1   : > { %v349_v24 = vpop.permute.xlu1 %348 }
 0x4b2   : > { %v354_v25 = vand.u32 %v349_v24, %v911_v22 }
 0x4b4   : > { %755 = vmatpush3.bf16.msra.mxu0 %v354_v25 }
 0x4b5   : > { %766 = vmatprep.subr.bf16.mxu0 %v834_v0 }
 0x4b8   : > { %v821_v26 = vpop.eup %820 }
 0x4b9   : > { %v345_v27 = vmul.f32 %v821_v26, %v815_v9 }
 0x4bb   : > { %v346_v28 = vsel %vm214_vm3, %v345_v27, 0.0 }
 0x4bc   : > { %v347_v29 = vpack.c.bf16 %v346_v28, %v346_v28 }
 0x4bd   : > { %v569_v30 = vpop.xlane.xlu0 %568 }
 0x4be   : > { %757 = vmatmul.mubr.msk.bf16.vlgmr.msra.gmra.mrb[4].mxu0 %vm232_vm7, %v347_v29 }
 0x4bf   : > { %768 = vmatprep.mubr.msk.bf16.mxu0 %vm835_vm0, %v834_v0 }
 0x4c1   : > { %v462_v2 = vpop.permute.xlu0 %461 }
 0x4c2   : > { %v467_v31 = vand.u32 %v462_v2, %v911_v22 }
 0x4c4   : > { %767 = vmatpush3.bf16.msra.mxu0 %v467_v31 }
 0x4c5   : > { %778 = vmatprep.subr.bf16.mxu0 %v834_v0 }
 0x4e2   : > { %v456_v32 = vpop.xlane.xlu1 %455 }
 0x4e3   : > { %822 = vrcp.f32 %v456_v32 }
 0x4e4   : > { %824 = vrcp.f32 %v569_v30 }
 0x4e6   : > { %v575_v34 = vpop.permute.xlu1 %574 }
 0x4e7   : > { %v580_v37 = vand.u32 %v575_v34, %v911_v22 }
 0x4ed   : > { %v823_v33 = vpop.eup %822 }
 0x4ee   : > { %v458_v35 = vmul.f32 %v823_v33, %v819_v20  ;;  %v825_v36 = vpop.eup %824 }
 0x4ef   : > { %v571_v40 = vmul.f32 %v825_v36, %v817_v15 }
 0x4f0   : > { %v459_v38 = vsel %vm214_vm3, %v458_v35, 0.0 }
 0x4f1   : > { %v460_v39 = vpack.c.bf16 %v459_v38, %v459_v38  ;;  %v572_v41 = vsel %vm214_vm3, %v571_v40, 0.0 }
 0x4f2   : > { %v573_v42 = vpack.c.bf16 %v572_v41, %v572_v41 }
 0x4f3   : > { %769 = vmatmul.mubr.msk.bf16.vlgmr.msra.gmra.mrb[8].mxu0 %vm232_vm7, %v460_v39 }
 0x4f4   : > { %779 = vmatpush3.bf16.msra.mxu0 %v580_v37  ;;  %780 = vmatprep.mubr.msk.bf16.mxu0 %vm835_vm0, %v834_v0 }
 0x4fb   : > { %781 = vmatmul.mubr.msk.bf16.vlgmr.msra.gmra.mrb[12].mxu0 %vm232_vm7, %v573_v42 }
 0x591   : > { %v390_v44 = vpop.f32.mrb[4].mxu0 }
 0x592   : > { %623 = vrot.lane.b32.xlu1 %v390_v44, %s849_s29  ;;  %v758_v22 = vpop.f32.mrb[5].mxu0 }
 0x593   : > { %v393_v45 = vpop.f32.mrb[6].mxu0 }
 0x594   : > { %v759_v46 = vpop.f32.mrb[7].mxu0 }
 0x5c6   : > { %v503_v47 = vpop.f32.mrb[8].mxu0 }
 0x5c7   : > { %627 = vrot.lane.b32.xlu0 %v503_v47, %s850_s30  ;;  %v770_v48 = vpop.f32.mrb[9].mxu0 }
 0x5c8   : > { %v506_v49 = vpop.f32.mrb[10].mxu0 }
 0x5c9   : > { %v771_v50 = vpop.f32.mrb[11].mxu0 }
 0x5ce   : > { %v616_v0 = vpop.f32.mrb[12].mxu0 }
 0x5cf   : > { %631 = vrot.lane.b32.xlu1 %v616_v0, %s851_s3  ;;  %v782_v11 = vpop.f32.mrb[13].mxu0 }
 0x5d0   : > { %v619_v51 = vpop.f32.mrb[14].mxu0 }
 0x5d1   : > { %v783_v52 = vpop.f32.mrb[15].mxu0 }
 0x604   : > { %v624_v53 = vpop.permute.xlu1 %623 }
 0x605   : > { %v634_v55 = vsel %vm160_vm1, %v937_v43, %v624_v53 }
 0x639   : > { %v628_v54 = vpop.permute.xlu0 %627 }
 0x63a   : > { %v636_v56 = vsel %vm635_vm8, %v634_v55, %v628_v54 }
 0x641   : > { %v632_v57 = vpop.permute.xlu1 %631 }
 0x642   : > { %v638_v58 = vsel %vm637_vm9, %v636_v56, %v632_v57 }
 0x643   : > { %640 = vst.msk [vmem:[%s152_s6] sm:$0x7] %vm639_vm10, %v638_v58 }
 0x644 PF: > { %s12_s9 = sadd.s32 1, %s832_s9  }
 0x645   : > { %p9_p4 = scmp.ge.s32.totalorder %s12_s9, 4  }
 0x647   :  { %11 = sbr.rel (!%p9_p4) target bundleno = 1 (0x1), region = 61 }

// kernel: transformer_encoder_forward.18
= control target key start
LH: loop header
LB: loop body
LE: loop exit
PB: predicated region body
PF: predicated region fallthrough
CT: control target
= control target key end

     0   :  { %vm28_vm0 = vcmask 261120   ;;  %v224_v10 = vmov 0.0   ;;  %vm225_vm1 = vmmov 0   ;;  %vm137_vm2 = vcmask 523264   ;;  %s324_s0 = inlined_call_operand.vmem [shape: f32[8,32], index: 0, kind: input, shape index: {}]   ;;  %s325_s3 = inlined_call_operand.vmem [shape: f32[32,64], index: 3, kind: input, shape index: {}]   ;;  %s326_s5 = inlined_call_operand.vmem [shape: f32[64,32], index: 5, kind: input, shape index: {}]   ;;  %s327_s1 = inlined_call_operand.vmem [shape: f32[1,32], index: 1, kind: input, shape index: {}]   ;;  %s328_s2 = inlined_call_operand.vmem [shape: f32[1,32], index: 2, kind: input, shape index: {}]   ;;  %s329_s4 = inlined_call_operand.vmem [shape: f32[1,64], index: 4, kind: input, shape index: {}]   ;;  %s330_s6 = inlined_call_operand.vmem [shape: f32[1,32], index: 6, kind: input, shape index: {}]   ;;  %s331_s7 = inlined_call_operand.vmem [shape: f32[8,32], index: 7, kind: output, shape index: {}]  }
   0x1   :  { %v27_v0 = vld [vmem:[%s324_s0] sm:$0xff]  ;;  %v61_v8 = vld [vmem:[%s325_s3 + $0x8] sm:$0xff]  ;;  %200 = vmatprep.subr.bf16.mxu0 %v224_v10  ;;  %v62_v11 = vld [vmem:[%s325_s3 + $0x10] sm:$0xff]  ;;  %208 = vmatprep.subr.bf16.mxu1 %v224_v10 }
   0x2   :  { %v29_v1 = vsel %vm28_vm0, %v27_v0, 0.0  ;;  %v60_v7 = vld [vmem:[%s325_s3] sm:$0xff]  ;;  %v63_v12 = vld [vmem:[%s325_s3 + $0x18] sm:$0xff]  ;;  %204 = vmatprep.mubr.msk.bf16.mxu0 %vm225_vm1, %v224_v10  ;;  %216 = vmatprep.mubr.msk.bf16.mxu1 %vm225_vm1, %v224_v10  ;;  %v119_v15 = vld [vmem:[%s326_s5 + $0x8] sm:$0xff] }
   0x3   :  { %30 = vadd.xlane.f32.xlu0 %v29_v1  ;;  %v64_v9 = vpack.c.bf16 %v61_v8, %v60_v7  ;;  %v65_v13 = vpack.c.bf16 %v63_v12, %v62_v11  ;;  %v118_v14 = vld [vmem:[%s326_s5] sm:$0xff]  ;;  %v120_v16 = vld [vmem:[%s326_s5 + $0x10] sm:$0xff]  ;;  %v121_v18 = vld [vmem:[%s326_s5 + $0x18] sm:$0xff] }
   0x4   :  { %v126_v17 = vpack.c.bf16 %v119_v15, %v118_v14  ;;  %v127_v19 = vpack.c.bf16 %v121_v18, %v120_v16  ;;  %v186_v24 = vld [vmem:[%s327_s1] ss:$0 sm:$0xff]  ;;  %v123_v31 = vld [vmem:[%s326_s5 + $0x28] sm:$0xff]  ;;  %v124_v33 = vld [vmem:[%s326_s5 + $0x30] sm:$0xff] }
   0x5   :  { %201 = vmatpush3.bf16.msra.mxu0 %v64_v9  ;;  %v187_v26 = vld [vmem:[%s328_s2] ss:$0 sm:$0xff]  ;;  %v125_v34 = vld [vmem:[%s326_s5 + $0x38] sm:$0xff] }
   0x6   :  { %202 = vmatprep.subr.bf16.mxu0 %v224_v10  ;;  %209 = vmatpush3.bf16.msra.mxu1 %v126_v17  ;;  %v122_v30 = vld [vmem:[%s326_s5 + $0x20] sm:$0xff]  ;;  %v129_v35 = vpack.c.bf16 %v125_v34, %v124_v33 }
   0x7   :  { %210 = vmatprep.subr.bf16.mxu1 %v224_v10  ;;  %v128_v32 = vpack.c.bf16 %v123_v31, %v122_v30  ;;  %v188_v36 = vld [vmem:[%s329_s4] ss:$0 sm:$0xff] }
   0x8   :  { %v190_v44 = vld [vmem:[%s330_s6] ss:$0 sm:$0xff] }
   0x9   :  { %203 = vmatpush3.bf16.msra.mxu0 %v65_v13 }
   0xa   :  { %211 = vmatpush3.bf16.msra.mxu1 %v127_v19 }
   0xb   :  { %212 = vmatprep.subr.bf16.mxu1 %v224_v10 }
   0xe   :  { %213 = vmatpush3.bf16.msra.mxu1 %v128_v32 }
   0xf   :  { %214 = vmatprep.subr.bf16.mxu1 %v224_v10 }
  0x12   :  { %215 = vmatpush3.bf16.msra.mxu1 %v129_v35 }
  0x90   :  { %v31_v2 = vpop.xlane.xlu0 %30 }
  0x91   :  { %v33_v3 = vmul.f32 0.03125, %v31_v2 }
  0x93   :  { %v34_v4 = vsub.f32 %v27_v0, %v33_v3 }
  0x95   :  { %v35_v5 = vmul.f32 %v34_v4, %v34_v4 }
  0x97   :  { %v36_v6 = vsel %vm28_vm0, %v35_v5, 0.0 }
  0x98   :  { %37 = vadd.xlane.f32.xlu0 %v36_v6 }
 0x125   :  { %v38_v20 = vpop.xlane.xlu0 %37 }
 0x126   :  { %v39_v21 = vmul.f32 0.03125, %v38_v20 }
 0x128   :  { %v40_v22 = vadd.f32 1e-12, %v39_v21 }
 0x12a   :  { %222 = vrsqrt.f32 %v40_v22 }
 0x134   :  { %v223_v23 = vpop.eup %222 }
 0x135   :  { %v42_v25 = vmul.f32 %v223_v23, %v34_v4 }
 0x137   :  { %v50_v27 = vmul.f32 %v186_v24, %v42_v25 }
 0x139   :  { %v58_v28 = vadd.f32 %v187_v26, %v50_v27 }
 0x13b   :  { %v59_v29 = vpack.c.bf16 %v58_v28, %v58_v28 }
 0x13d   :  { %205 = vmatmul.mubr.msk.bf16.vlgmr.msra.gmra.mrb[0].mxu0 %vm28_vm0, %v59_v29 }
 0x210   :  { %v110_v37 = vpop.f32.mrb[0].mxu0 }
 0x211   :  { %v111_v38 = vadd.f32 %v188_v36, %v110_v37  ;;  %v206_v39 = vpop.f32.mrb[1].mxu0 }
 0x212   :  { %v113_v40 = vpop.f32.mrb[2].mxu0 }
 0x213   :  { %v116_v41 = vmax.f32 %v111_v38, 0.0  ;;  %v207_v42 = vpop.f32.mrb[3].mxu0 }
 0x215   :  { %v117_v43 = vpack.c.bf16 %v116_v41, %v116_v41 }
 0x217   :  { %217 = vmatmul.mubr.msk.bf16.vlgmr.msra.gmra.mrb[0].mxu1 %vm137_vm2, %v117_v43 }
 0x2ea   :  { %v175_v45 = vpop.f32.mrb[0].mxu1 }
 0x2eb   :  { %v176_v46 = vadd.f32 %v190_v44, %v175_v45  ;;  %v218_v47 = vpop.f32.mrb[1].mxu1 }
 0x2ec   :  { %v178_v48 = vpop.f32.mrb[2].mxu1 }
 0x2ed   :  { %181 = vst.msk [vmem:[%s331_s7] sm:$0xff] %vm28_vm0, %v176_v46  ;;  %v219_v49 = vpop.f32.mrb[3].mxu1 }

// kernel: transformer_encoder_forward.23
= control target key start
LH: loop header
LB: loop body
LE: loop exit
PB: predicated region body
PF: predicated region fallthrough
CT: control target
= control target key end

     0   :  { %vm15_vm0 = vcmask 261120   ;;  %s90_s0 = inlined_call_operand.vmem [shape: f32[8,32], index: 0, kind: input, shape index: {}]   ;;  %s91_s1 = inlined_call_operand.vmem [shape: f32[1,32], index: 1, kind: input, shape index: {}]   ;;  %s92_s2 = inlined_call_operand.vmem [shape: f32[1,32], index: 2, kind: input, shape index: {}]   ;;  %s93_s3 = inlined_call_operand.vmem [shape: f32[8,32], index: 3, kind: output, shape index: {}]  }
   0x1   :  { %v14_v0 = vld [vmem:[%s90_s0] sm:$0xff] }
   0x2   :  { %v16_v1 = vsel %vm15_vm0, %v14_v0, 0.0  ;;  %v51_v11 = vld [vmem:[%s91_s1] ss:$0 sm:$0xff] }
   0x3   :  { %17 = vadd.xlane.f32.xlu0 %v16_v1  ;;  %v52_v13 = vld [vmem:[%s92_s2] ss:$0 sm:$0xff] }
  0x90   :  { %v18_v2 = vpop.xlane.xlu0 %17 }
  0x91   :  { %v20_v3 = vmul.f32 0.03125, %v18_v2 }
  0x93   :  { %v21_v4 = vsub.f32 %v14_v0, %v20_v3 }
  0x95   :  { %v22_v5 = vmul.f32 %v21_v4, %v21_v4 }
  0x97   :  { %v23_v6 = vsel %vm15_vm0, %v22_v5, 0.0 }
  0x98   :  { %24 = vadd.xlane.f32.xlu0 %v23_v6 }
 0x125   :  { %v25_v7 = vpop.xlane.xlu0 %24 }
 0x126   :  { %v26_v8 = vmul.f32 0.03125, %v25_v7 }
 0x128   :  { %v27_v9 = vadd.f32 1e-12, %v26_v8 }
 0x12a   :  { %53 = vrsqrt.f32 %v27_v9 }
 0x134   :  { %v54_v10 = vpop.eup %53 }
 0x135   :  { %v29_v12 = vmul.f32 %v54_v10, %v21_v4 }
 0x137   :  { %v37_v14 = vmul.f32 %v51_v11, %v29_v12 }
 0x139   :  { %v45_v15 = vadd.f32 %v52_v13, %v37_v14 }
 0x13b   :  { %46 = vst.msk [vmem:[%s93_s3] sm:$0xff] %vm15_vm0, %v45_v15 }

</bundles_post_ra>
